<compile_context>
chip_gen: v6e
topology: v6e:2x2x1
jax: 0.10.0
libtpu: 0.0.40
codegen_flags: <defaults>
</compile_context>

<pallas_src>
import functools

import jax
import jax.numpy as jnp
from jax import lax
from jax.experimental import pallas as pl
from jax.experimental.pallas import tpu as pltpu

# ---- hyperparameters (deterministic stand-ins for args / pr in the module) ----
TAU = 0.05            # pr.tau
CYCLE_NUM = 1         # args.cycle_num  (torch.matrix_power exponent)
BIDIRECTIONAL = True  # args.bidirectional
SKIP_NODE = False     # args.skip_node  (False -> static shapes, no row slicing)
SMOOTH = 1.0          # args.smooth     (> 0 -> smooth loss active)
CRW_RATE = 1.0        # args.crw_rate
SYN_RATE = 1.0        # args.synthetic_rate
SAMP_SR = 16000.0     # pr.samp_sr
MAX_DELAY = 0.001     # pr.max_delay
PATCH_STRIDE = 8.0    # pr.patch_stride
MDO = int(SAMP_SR * MAX_DELAY / PATCH_STRIDE)  # max_delay_offset = floor(...) = 2
EPS = 1e-20
# TODO(synk): skip_node=True with nonzero shift_offset implies data-dependent
# (dynamic-shape) row slicing of the syn matrix; not expressible with static
# Pallas shapes, so args.skip_node is fixed to False here.


def _loss_kernel(fl_ref, fr_ref, fn_ref, shift_ref, dt_ref, out_ref,
                 *, bt, m, batch):
    """Per-block kernel over Bt batches. Writes (crw, syn, smooth) partial sums."""
    blk = pl.program_id(0)

    # Validity mask for padded tail batches (batch is the true, unpadded B).
    b_iota = lax.broadcasted_iota(jnp.int32, (bt, 1), 0)
    bvalid = (blk * bt + b_iota) < batch          # (bt, 1) bool
    bvalid3 = bvalid[:, :, None]                  # (bt, 1, 1) bool

    # --- F.normalize(p=2, dim=-1) ---
    def l2norm(x):
        nrm = jnp.sqrt(jnp.sum(x * x, axis=-1, keepdims=True))
        return x / jnp.maximum(nrm, 1e-12)

    fl = l2norm(fl_ref[...])   # (bt, m, d)
    fr = l2norm(fr_ref[...])
    fn = l2norm(fn_ref[...])

    # --- feat2mat: feat_1 @ feat_2^T / tau (batched over the Bt block) ---
    aff_l2r = jnp.einsum('bmd,bnd->bmn', fl, fr,
                         preferred_element_type=jnp.float32) / TAU   # (bt, m, m)
    aff_r2l = jnp.einsum('bmd,bnd->bmn', fr, fn,
                         preferred_element_type=jnp.float32) / TAU

    def softmax_lse(x):
        mx = jnp.max(x, axis=-1, keepdims=True)
        e = jnp.exp(x - mx)
        s = jnp.sum(e, axis=-1, keepdims=True)
        return e / s, jnp.log(s) + mx             # softmax, logsumexp

    sa, lse_l2r = softmax_lse(aff_l2r)            # lse reused for the syn CE
    sb, _ = softmax_lse(aff_r2l)

    def bmm(a, c):
        return jnp.einsum('bij,bjk->bik', a, c,
                          preferred_element_type=jnp.float32)

    def matpow(c):
        out = c
        for _ in range(CYCLE_NUM - 1):
            out = bmm(out, c)
        return out

    # cycle matrices (cycle shift offset is zero in VoxCelebAVITDLoss)
    c_l = matpow(bmm(sa, sb))
    c_r = matpow(bmm(sb, sa))

    row = lax.broadcasted_iota(jnp.int32, (bt, m, m), 1)
    col = lax.broadcasted_iota(jnp.int32, (bt, m, m), 2)
    is_diag = row == col

    def lse(x):
        mx = jnp.max(x, axis=-1, keepdims=True)
        return jnp.log(jnp.sum(jnp.exp(x - mx), axis=-1, keepdims=True)) + mx

    # --- CRW loss contribution: CE(log(cycle + eps), arange(M)) for both dirs ---
    def ce_diag_rows(logits):                      # labels == arange(M): diagonal
        picked = jnp.sum(jnp.where(is_diag, logits, 0.0), axis=-1, keepdims=True)
        return lse(logits) - picked                # (bt, m, 1)

    crw_rows = ce_diag_rows(jnp.log(c_l + EPS))
    if BIDIRECTIONAL:
        crw_rows = crw_rows + ce_diag_rows(jnp.log(c_r + EPS))
    crw_sum = jnp.sum(jnp.where(bvalid3, crw_rows, 0.0))

    # --- synthetic loss contribution: CE(aff_L2R, clamp(arange(M) - shift)) ---
    shift = shift_ref[...][:, :, None]             # (bt, 1, 1) int32
    syn_label = jnp.clip(row - shift, 0, m - 1)
    syn_picked = jnp.sum(jnp.where(col == syn_label, aff_l2r, 0.0),
                         axis=-1, keepdims=True)
    syn_rows = lse_l2r - syn_picked                # (bt, m, 1)
    syn_sum = jnp.sum(jnp.where(bvalid3, syn_rows, 0.0))

    # --- smooth loss contribution (crw_itd_estimation + SmoothL1 sum) ---
    band = (jnp.abs(row - col) <= MDO).astype(jnp.float32)
    masked = aff_l2r * band
    # NOTE: mirrors the torch code's quirk (exact in-band zeros get masked too).
    masked = jnp.where(masked == 0.0, jnp.float32(-1e20), masked)
    sm, _ = softmax_lse(masked)                    # (bt, m, m)
    dt = dt_ref[...] * SAMP_SR                     # (bt, 1, m)
    itd = jnp.sum(sm * dt, axis=-1)                # (bt, m)

    # Neighbour difference via a tiny (m, m) difference matrix on the MXU:
    # dif[:, j] = itd[:, j] - itd[:, j+1]; valid j in [MDO, m - MDO - 2].
    r2 = lax.broadcasted_iota(jnp.int32, (m, m), 0)
    c2 = lax.broadcasted_iota(jnp.int32, (m, m), 1)
    dmat = ((r2 == c2).astype(jnp.float32)
            - (r2 == c2 + 1).astype(jnp.float32))
    dif = jnp.dot(itd, dmat, preferred_element_type=jnp.float32)   # (bt, m)
    ad = jnp.abs(dif)
    sl1 = jnp.where(ad < 1.0, 0.5 * dif * dif, ad - 0.5)           # SmoothL1, beta=1
    jidx = lax.broadcasted_iota(jnp.int32, (bt, m), 1)
    dvalid = jnp.logical_and(jidx >= MDO, jidx <= m - MDO - 2)
    dvalid = jnp.logical_and(dvalid, bvalid)                        # (bt, m)
    smooth_sum = jnp.sum(jnp.where(dvalid, sl1, 0.0))

    out_ref[0, 0] = crw_sum
    out_ref[0, 1] = syn_sum
    out_ref[0, 2] = smooth_sum


def voxceleb_avitd_loss(feat_left, feat_right, feat_noaug_left, shift_offset,
                        delay_time, *, block_b=64):
    B, M, D = feat_left.shape
    Bt = min(block_b, B)
    num_blocks = pl.cdiv(B, Bt)
    B_pad = num_blocks * Bt

    shift2 = shift_offset.astype(jnp.int32).reshape(B, 1)
    if B_pad != B:
        pad_b = B_pad - B
        feat_left = jnp.pad(feat_left, ((0, pad_b), (0, 0), (0, 0)))
        feat_right = jnp.pad(feat_right, ((0, pad_b), (0, 0), (0, 0)))
        feat_noaug_left = jnp.pad(feat_noaug_left, ((0, pad_b), (0, 0), (0, 0)))
        delay_time = jnp.pad(delay_time, ((0, pad_b), (0, 0), (0, 0)))
        shift2 = jnp.pad(shift2, ((0, pad_b), (0, 0)))

    kernel = functools.partial(_loss_kernel, bt=Bt, m=M, batch=B)

    partials = pl.pallas_call(
        kernel,
        out_shape=jax.ShapeDtypeStruct((num_blocks, 3), jnp.float32),
        grid_spec=pltpu.PrefetchScalarGridSpec(
            num_scalar_prefetch=0,
            grid=(num_blocks,),
            in_specs=[
                pl.BlockSpec((Bt, M, D), lambda i: (i, 0, 0)),  # left
                pl.BlockSpec((Bt, M, D), lambda i: (i, 0, 0)),  # right
                pl.BlockSpec((Bt, M, D), lambda i: (i, 0, 0)),  # noaug left
                pl.BlockSpec((Bt, 1), lambda i: (i, 0)),        # shift_offset
                pl.BlockSpec((Bt, 1, M), lambda i: (i, 0, 0)),  # delay_time
            ],
            out_specs=pl.BlockSpec((1, 3), lambda i: (i, 0),
                                   memory_space=pltpu.SMEM),
        ),
        compiler_params=pltpu.CompilerParams(
            dimension_semantics=("parallel",)),   # independent per-block partials
    )(feat_left, feat_right, feat_noaug_left, shift2, delay_time)

    totals = jnp.sum(partials, axis=0)                       # (3,)
    n_cycle_rows = B * (2 if BIDIRECTIONAL else 1) * M
    crw_loss = totals[0] / n_cycle_rows                      # CE mean reduction
    syn_loss = totals[1] / (B * M)
    smooth_loss = SMOOTH * totals[2] / (B * (M - 2 * MDO - 1))  # SmoothL1 mean
    return CRW_RATE * crw_loss + SYN_RATE * syn_loss + smooth_loss


# ---------------- pure-JAX reference (mirrors the torch forward) ----------------
def _reference_loss(fl, fr, fn, shift, dt):
    B, M, _ = fl.shape

    def norm(x):
        n = jnp.sqrt(jnp.sum(x * x, axis=-1, keepdims=True))
        return x / jnp.maximum(n, 1e-12)

    fl, fr, fn = norm(fl), norm(fr), norm(fn)
    aff_l2r = jnp.einsum('bmd,bnd->bmn', fl, fr) / TAU
    aff_r2l = jnp.einsum('bmd,bnd->bmn', fr, fn) / TAU
    sa = jax.nn.softmax(aff_l2r, axis=-1)
    sb = jax.nn.softmax(aff_r2l, axis=-1)

    def matpow(c, k):
        out = c
        for _ in range(k - 1):
            out = jnp.einsum('bij,bjk->bik', out, c)
        return out

    c_l = matpow(jnp.einsum('bij,bjk->bik', sa, sb), CYCLE_NUM)
    c_r = matpow(jnp.einsum('bij,bjk->bik', sb, sa), CYCLE_NUM)
    cyc = jnp.concatenate([c_l, c_r], axis=1) if BIDIRECTIONAL else c_l
    cyc = cyc.reshape(-1, M)
    labels = jnp.tile(jnp.arange(M), cyc.shape[0] // M)
    logits = jnp.log(cyc + EPS)
    nll = jax.nn.logsumexp(logits, -1) - logits[jnp.arange(cyc.shape[0]), labels]
    crw = jnp.mean(nll)

    lab = jnp.clip(jnp.arange(M)[None, :] - shift[:, None], 0, M - 1).reshape(-1)
    syn_logits = aff_l2r.reshape(-1, M)
    syn_nll = (jax.nn.logsumexp(syn_logits, -1)
               - syn_logits[jnp.arange(B * M), lab])
    syn = jnp.mean(syn_nll)

    r = jnp.arange(M)[:, None]
    c = jnp.arange(M)[None, :]
    band = (jnp.abs(r - c) <= MDO).astype(jnp.float32)
    masked = aff_l2r * band[None]
    masked = jnp.where(masked == 0.0, -1e20, masked)
    sm = jax.nn.softmax(masked, axis=-1)
    itd = jnp.sum(sm * (dt * SAMP_SR), axis=-1)          # (B, M)
    itd = itd[:, MDO:M - MDO]
    dif = itd[:, :-1] - itd[:, 1:]
    ad = jnp.abs(dif)
    sl1 = jnp.where(ad < 1.0, 0.5 * dif * dif, ad - 0.5)
    smooth = SMOOTH * jnp.mean(sl1)

    return CRW_RATE * crw + SYN_RATE * syn + smooth


if __name__ == "__main__":
    B, M, D = 2, 16, 32
    key = jax.random.PRNGKey(0)
    k1, k2, k3, k4 = jax.random.split(key, 4)
    feat_left = jax.random.normal(k1, (B, M, D), jnp.float32)
    feat_right = jax.random.normal(k2, (B, M, D), jnp.float32)
    feat_noaug_left = jax.random.normal(k3, (B, M, D), jnp.float32)
    shift_offset = jnp.array([1, -2], dtype=jnp.int32)
    delay_time = jax.random.uniform(k4, (B, 1, M), jnp.float32,
                                    minval=-MAX_DELAY, maxval=MAX_DELAY)

    loss = voxceleb_avitd_loss(feat_left, feat_right, feat_noaug_left,
                               shift_offset, delay_time)
    loss = jax.block_until_ready(loss)

    ref = _reference_loss(feat_left, feat_right, feat_noaug_left,
                          shift_offset, delay_time)
    assert jnp.isfinite(loss), f"non-finite loss: {loss}"
    assert jnp.allclose(loss, ref, rtol=1e-2, atol=1e-3), (
        f"mismatch: pallas={float(loss)} ref={float(ref)}")
    print("KERNEL_OK")
</pallas_src>

<mosaic_0001>
module attributes {stable_mosaic.version = 11 : i64} {
  func.func @_loss_kernel(%arg0: i32, %arg1: memref<2x16x32xf32, #tpu.memory_space<vmem>>, %arg2: memref<2x16x32xf32, #tpu.memory_space<vmem>>, %arg3: memref<2x16x32xf32, #tpu.memory_space<vmem>>, %arg4: memref<2x1xi32, #tpu.memory_space<vmem>>, %arg5: memref<2x1x16xf32, #tpu.memory_space<vmem>>, %arg6: memref<1x3xf32, #tpu.memory_space<smem>>) attributes {dimension_semantics = [#tpu.dimension_semantics<parallel>], iteration_bounds = array<i64: 1>, scalar_prefetch = 0 : i64, scratch_operands = 0 : i64, tpu.core_type = #tpu.core_type<tc>, window_params = [{transform_indices = @transform_0, window_bounds = array<i64: 2, 16, 32>}, {transform_indices = @transform_1, window_bounds = array<i64: 2, 16, 32>}, {transform_indices = @transform_2, window_bounds = array<i64: 2, 16, 32>}, {transform_indices = @transform_3, window_bounds = array<i64: 2, 1>}, {transform_indices = @transform_4, window_bounds = array<i64: 2, 1, 16>}, {transform_indices = @transform_5, window_bounds = array<i64: 1, 3>}]} {
    %0 = tpu.iota {dimensions = array<i32: 0>} : vector<2x1xi32>
    %c2_i32 = arith.constant 2 : i32
    %1 = arith.muli %arg0, %c2_i32 : i32
    %2 = vector.broadcast %1 : i32 to vector<2x1xi32>
    %3 = arith.addi %2, %0 : vector<2x1xi32>
    %c2_i32_0 = arith.constant 2 : i32
    %4 = vector.broadcast %c2_i32_0 : i32 to vector<2x1xi32>
    %5 = arith.cmpi slt, %3, %4 : vector<2x1xi32>
    %6 = vector.shape_cast %5 : vector<2x1xi1> to vector<2x1x1xi1>
    %c0 = arith.constant 0 : index
    %c0_1 = arith.constant 0 : index
    %c0_2 = arith.constant 0 : index
    %7 = vector.load %arg1[%c0, %c0_1, %c0_2] : memref<2x16x32xf32, #tpu.memory_space<vmem>>, vector<2x16x32xf32>
    %8 = arith.mulf %7, %7 : vector<2x16x32xf32>
    %cst = arith.constant dense<0.000000e+00> : vector<2x16xf32>
    %9 = vector.multi_reduction <add>, %8, %cst [2] : vector<2x16x32xf32> to vector<2x16xf32>
    %10 = vector.shape_cast %9 : vector<2x16xf32> to vector<2x16x1xf32>
    %11 = math.sqrt %10 : vector<2x16x1xf32>
    %cst_3 = arith.constant 9.99999996E-13 : f32
    %12 = vector.broadcast %cst_3 : f32 to vector<2x16x1xf32>
    %13 = arith.maximumf %11, %12 : vector<2x16x1xf32>
    %14 = vector.broadcast %13 : vector<2x16x1xf32> to vector<2x16x32xf32>
    %15 = arith.divf %7, %14 : vector<2x16x32xf32>
    %c0_4 = arith.constant 0 : index
    %c0_5 = arith.constant 0 : index
    %c0_6 = arith.constant 0 : index
    %16 = vector.load %arg2[%c0_4, %c0_5, %c0_6] : memref<2x16x32xf32, #tpu.memory_space<vmem>>, vector<2x16x32xf32>
    %17 = arith.mulf %16, %16 : vector<2x16x32xf32>
    %cst_7 = arith.constant dense<0.000000e+00> : vector<2x16xf32>
    %18 = vector.multi_reduction <add>, %17, %cst_7 [2] : vector<2x16x32xf32> to vector<2x16xf32>
    %19 = vector.shape_cast %18 : vector<2x16xf32> to vector<2x16x1xf32>
    %20 = math.sqrt %19 : vector<2x16x1xf32>
    %cst_8 = arith.constant 9.99999996E-13 : f32
    %21 = vector.broadcast %cst_8 : f32 to vector<2x16x1xf32>
    %22 = arith.maximumf %20, %21 : vector<2x16x1xf32>
    %23 = vector.broadcast %22 : vector<2x16x1xf32> to vector<2x16x32xf32>
    %24 = arith.divf %16, %23 : vector<2x16x32xf32>
    %c0_9 = arith.constant 0 : index
    %c0_10 = arith.constant 0 : index
    %c0_11 = arith.constant 0 : index
    %25 = vector.load %arg3[%c0_9, %c0_10, %c0_11] : memref<2x16x32xf32, #tpu.memory_space<vmem>>, vector<2x16x32xf32>
    %26 = arith.mulf %25, %25 : vector<2x16x32xf32>
    %cst_12 = arith.constant dense<0.000000e+00> : vector<2x16xf32>
    %27 = vector.multi_reduction <add>, %26, %cst_12 [2] : vector<2x16x32xf32> to vector<2x16xf32>
    %28 = vector.shape_cast %27 : vector<2x16xf32> to vector<2x16x1xf32>
    %29 = math.sqrt %28 : vector<2x16x1xf32>
    %cst_13 = arith.constant 9.99999996E-13 : f32
    %30 = vector.broadcast %cst_13 : f32 to vector<2x16x1xf32>
    %31 = arith.maximumf %29, %30 : vector<2x16x1xf32>
    %32 = vector.broadcast %31 : vector<2x16x1xf32> to vector<2x16x32xf32>
    %33 = arith.divf %25, %32 : vector<2x16x32xf32>
    "tpu.trace_start"() <{level = 10 : i32, message = "bmd,bnd->bmn"}> : () -> ()
    %cst_14 = arith.constant dense<0.000000e+00> : vector<2x16x16xf32>
    %34 = tpu.matmul %15, %24, %cst_14 {dimension_numbers = #tpu.dot_dimension_numbers<[2], [2], [1], [1], [0, 0, 0, 1, 1, 1], [0], [0]>} : vector<2x16x32xf32>, vector<2x16x32xf32>, vector<2x16x16xf32> -> vector<2x16x16xf32>
    "tpu.trace_stop"() : () -> ()
    %cst_15 = arith.constant 5.000000e-02 : f32
    %35 = vector.broadcast %cst_15 : f32 to vector<2x16x16xf32>
    %36 = arith.divf %34, %35 : vector<2x16x16xf32>
    "tpu.trace_start"() <{level = 10 : i32, message = "bmd,bnd->bmn"}> : () -> ()
    %cst_16 = arith.constant dense<0.000000e+00> : vector<2x16x16xf32>
    %37 = tpu.matmul %24, %33, %cst_16 {dimension_numbers = #tpu.dot_dimension_numbers<[2], [2], [1], [1], [0, 0, 0, 1, 1, 1], [0], [0]>} : vector<2x16x32xf32>, vector<2x16x32xf32>, vector<2x16x16xf32> -> vector<2x16x16xf32>
    "tpu.trace_stop"() : () -> ()
    %cst_17 = arith.constant 5.000000e-02 : f32
    %38 = vector.broadcast %cst_17 : f32 to vector<2x16x16xf32>
    %39 = arith.divf %37, %38 : vector<2x16x16xf32>
    %cst_18 = arith.constant dense<0xFF800000> : vector<2x16xf32>
    %40 = vector.multi_reduction <maximumf>, %36, %cst_18 [2] : vector<2x16x16xf32> to vector<2x16xf32>
    %41 = vector.shape_cast %40 : vector<2x16xf32> to vector<2x16x1xf32>
    %42 = vector.broadcast %41 : vector<2x16x1xf32> to vector<2x16x16xf32>
    %43 = arith.subf %36, %42 : vector<2x16x16xf32>
    %44 = math.exp %43 : vector<2x16x16xf32>
    %cst_19 = arith.constant dense<0.000000e+00> : vector<2x16xf32>
    %45 = vector.multi_reduction <add>, %44, %cst_19 [2] : vector<2x16x16xf32> to vector<2x16xf32>
    %46 = vector.shape_cast %45 : vector<2x16xf32> to vector<2x16x1xf32>
    %47 = vector.broadcast %46 : vector<2x16x1xf32> to vector<2x16x16xf32>
    %48 = arith.divf %44, %47 : vector<2x16x16xf32>
    %49 = math.log %46 : vector<2x16x1xf32>
    %50 = arith.addf %49, %41 : vector<2x16x1xf32>
    %cst_20 = arith.constant dense<0xFF800000> : vector<2x16xf32>
    %51 = vector.multi_reduction <maximumf>, %39, %cst_20 [2] : vector<2x16x16xf32> to vector<2x16xf32>
    %52 = vector.shape_cast %51 : vector<2x16xf32> to vector<2x16x1xf32>
    %53 = vector.broadcast %52 : vector<2x16x1xf32> to vector<2x16x16xf32>
    %54 = arith.subf %39, %53 : vector<2x16x16xf32>
    %55 = math.exp %54 : vector<2x16x16xf32>
    %cst_21 = arith.constant dense<0.000000e+00> : vector<2x16xf32>
    %56 = vector.multi_reduction <add>, %55, %cst_21 [2] : vector<2x16x16xf32> to vector<2x16xf32>
    %57 = vector.shape_cast %56 : vector<2x16xf32> to vector<2x16x1xf32>
    %58 = vector.broadcast %57 : vector<2x16x1xf32> to vector<2x16x16xf32>
    %59 = arith.divf %55, %58 : vector<2x16x16xf32>
    "tpu.trace_start"() <{level = 10 : i32, message = "bij,bjk->bik"}> : () -> ()
    %cst_22 = arith.constant dense<0.000000e+00> : vector<2x16x16xf32>
    %60 = tpu.matmul %48, %59, %cst_22 {dimension_numbers = #tpu.dot_dimension_numbers<[2], [1], [1], [2], [0, 0, 0, 1, 1, 2], [0], [0]>} : vector<2x16x16xf32>, vector<2x16x16xf32>, vector<2x16x16xf32> -> vector<2x16x16xf32>
    %cst_23 = arith.constant dense<0.000000e+00> : vector<2x16x16xf32>
    %61 = tpu.matmul %59, %48, %cst_23 {dimension_numbers = #tpu.dot_dimension_numbers<[2], [1], [1], [2], [0, 0, 0, 1, 1, 2], [0], [0]>} : vector<2x16x16xf32>, vector<2x16x16xf32>, vector<2x16x16xf32> -> vector<2x16x16xf32>
    "tpu.trace_stop"() : () -> ()
    %62 = tpu.iota {dimensions = array<i32: 1>} : vector<2x16x16xi32>
    %63 = tpu.iota {dimensions = array<i32: 2>} : vector<2x16x16xi32>
    %64 = arith.cmpi eq, %62, %63 : vector<2x16x16xi32>
    %cst_24 = arith.constant 9.99999968E-21 : f32
    %65 = vector.broadcast %cst_24 : f32 to vector<2x16x16xf32>
    %66 = arith.addf %60, %65 : vector<2x16x16xf32>
    %67 = math.log %66 : vector<2x16x16xf32>
    %cst_25 = arith.constant 0.000000e+00 : f32
    %68 = vector.broadcast %cst_25 : f32 to vector<2x16x16xf32>
    %69 = arith.select %64, %67, %68 : vector<2x16x16xi1>, vector<2x16x16xf32>
    %cst_26 = arith.constant dense<0.000000e+00> : vector<2x16xf32>
    %70 = vector.multi_reduction <add>, %69, %cst_26 [2] : vector<2x16x16xf32> to vector<2x16xf32>
    %71 = vector.shape_cast %70 : vector<2x16xf32> to vector<2x16x1xf32>
    %cst_27 = arith.constant dense<0xFF800000> : vector<2x16xf32>
    %72 = vector.multi_reduction <maximumf>, %67, %cst_27 [2] : vector<2x16x16xf32> to vector<2x16xf32>
    %73 = vector.shape_cast %72 : vector<2x16xf32> to vector<2x16x1xf32>
    %74 = vector.broadcast %73 : vector<2x16x1xf32> to vector<2x16x16xf32>
    %75 = arith.subf %67, %74 : vector<2x16x16xf32>
    %76 = math.exp %75 : vector<2x16x16xf32>
    %cst_28 = arith.constant dense<0.000000e+00> : vector<2x16xf32>
    %77 = vector.multi_reduction <add>, %76, %cst_28 [2] : vector<2x16x16xf32> to vector<2x16xf32>
    %78 = vector.shape_cast %77 : vector<2x16xf32> to vector<2x16x1xf32>
    %79 = math.log %78 : vector<2x16x1xf32>
    %80 = arith.addf %79, %73 : vector<2x16x1xf32>
    %81 = arith.subf %80, %71 : vector<2x16x1xf32>
    %cst_29 = arith.constant 9.99999968E-21 : f32
    %82 = vector.broadcast %cst_29 : f32 to vector<2x16x16xf32>
    %83 = arith.addf %61, %82 : vector<2x16x16xf32>
    %84 = math.log %83 : vector<2x16x16xf32>
    %cst_30 = arith.constant 0.000000e+00 : f32
    %85 = vector.broadcast %cst_30 : f32 to vector<2x16x16xf32>
    %86 = arith.select %64, %84, %85 : vector<2x16x16xi1>, vector<2x16x16xf32>
    %cst_31 = arith.constant dense<0.000000e+00> : vector<2x16xf32>
    %87 = vector.multi_reduction <add>, %86, %cst_31 [2] : vector<2x16x16xf32> to vector<2x16xf32>
    %88 = vector.shape_cast %87 : vector<2x16xf32> to vector<2x16x1xf32>
    %cst_32 = arith.constant dense<0xFF800000> : vector<2x16xf32>
    %89 = vector.multi_reduction <maximumf>, %84, %cst_32 [2] : vector<2x16x16xf32> to vector<2x16xf32>
    %90 = vector.shape_cast %89 : vector<2x16xf32> to vector<2x16x1xf32>
    %91 = vector.broadcast %90 : vector<2x16x1xf32> to vector<2x16x16xf32>
    %92 = arith.subf %84, %91 : vector<2x16x16xf32>
    %93 = math.exp %92 : vector<2x16x16xf32>
    %cst_33 = arith.constant dense<0.000000e+00> : vector<2x16xf32>
    %94 = vector.multi_reduction <add>, %93, %cst_33 [2] : vector<2x16x16xf32> to vector<2x16xf32>
    %95 = vector.shape_cast %94 : vector<2x16xf32> to vector<2x16x1xf32>
    %96 = math.log %95 : vector<2x16x1xf32>
    %97 = arith.addf %96, %90 : vector<2x16x1xf32>
    %98 = arith.subf %97, %88 : vector<2x16x1xf32>
    %99 = arith.addf %81, %98 : vector<2x16x1xf32>
    %cst_34 = arith.constant 0.000000e+00 : f32
    %100 = vector.shape_cast %6 : vector<2x1x1xi1> to vector<2x1x1xi1>
    %101 = vector.broadcast %100 : vector<2x1x1xi1> to vector<2x16x1xi1>
    %102 = vector.broadcast %cst_34 : f32 to vector<2x16x1xf32>
    %103 = arith.select %101, %99, %102 : vector<2x16x1xi1>, vector<2x16x1xf32>
    %104 = vector.shape_cast %103 : vector<2x16x1xf32> to vector<1x2x16x1xf32>
    %cst_35 = arith.constant dense<0.000000e+00> : vector<1xf32>
    %105 = vector.multi_reduction <add>, %104, %cst_35 [1, 2, 3] : vector<1x2x16x1xf32> to vector<1xf32>
    %106 = vector.shape_cast %105 : vector<1xf32> to vector<1x1x1x1xf32>
    %107 = vector.extract %106[0, 0, 0, 0] : f32 from vector<1x1x1x1xf32>
    %c0_36 = arith.constant 0 : index
    %c0_37 = arith.constant 0 : index
    %108 = vector.load %arg4[%c0_36, %c0_37] : memref<2x1xi32, #tpu.memory_space<vmem>>, vector<2x1xi32>
    %109 = vector.shape_cast %108 : vector<2x1xi32> to vector<2x1x1xi32>
    %110 = vector.broadcast %109 : vector<2x1x1xi32> to vector<2x16x16xi32>
    %111 = arith.subi %62, %110 : vector<2x16x16xi32>
    %c0_i32 = arith.constant 0 : i32
    %c15_i32 = arith.constant 15 : i32
    %112 = vector.broadcast %c0_i32 : i32 to vector<2x16x16xi32>
    %113 = arith.maxsi %112, %111 : vector<2x16x16xi32>
    %114 = vector.broadcast %c15_i32 : i32 to vector<2x16x16xi32>
    %115 = arith.minsi %114, %113 : vector<2x16x16xi32>
    %116 = arith.cmpi eq, %63, %115 : vector<2x16x16xi32>
    %cst_38 = arith.constant 0.000000e+00 : f32
    %117 = vector.broadcast %cst_38 : f32 to vector<2x16x16xf32>
    %118 = arith.select %116, %36, %117 : vector<2x16x16xi1>, vector<2x16x16xf32>
    %cst_39 = arith.constant dense<0.000000e+00> : vector<2x16xf32>
    %119 = vector.multi_reduction <add>, %118, %cst_39 [2] : vector<2x16x16xf32> to vector<2x16xf32>
    %120 = vector.shape_cast %119 : vector<2x16xf32> to vector<2x16x1xf32>
    %121 = arith.subf %50, %120 : vector<2x16x1xf32>
    %cst_40 = arith.constant 0.000000e+00 : f32
    %122 = vector.shape_cast %6 : vector<2x1x1xi1> to vector<2x1x1xi1>
    %123 = vector.broadcast %122 : vector<2x1x1xi1> to vector<2x16x1xi1>
    %124 = vector.broadcast %cst_40 : f32 to vector<2x16x1xf32>
    %125 = arith.select %123, %121, %124 : vector<2x16x1xi1>, vector<2x16x1xf32>
    %126 = vector.shape_cast %125 : vector<2x16x1xf32> to vector<1x2x16x1xf32>
    %cst_41 = arith.constant dense<0.000000e+00> : vector<1xf32>
    %127 = vector.multi_reduction <add>, %126, %cst_41 [1, 2, 3] : vector<1x2x16x1xf32> to vector<1xf32>
    %128 = vector.shape_cast %127 : vector<1xf32> to vector<1x1x1x1xf32>
    %129 = vector.extract %128[0, 0, 0, 0] : f32 from vector<1x1x1x1xf32>
    %130 = arith.subi %62, %63 : vector<2x16x16xi32>
    %131 = math.absi %130 : vector<2x16x16xi32>
    %c2_i32_42 = arith.constant 2 : i32
    %132 = vector.broadcast %c2_i32_42 : i32 to vector<2x16x16xi32>
    %133 = arith.cmpi sle, %131, %132 : vector<2x16x16xi32>
    %134 = arith.extui %133 : vector<2x16x16xi1> to vector<2x16x16xi32>
    %135 = arith.sitofp %134 : vector<2x16x16xi32> to vector<2x16x16xf32>
    %136 = arith.mulf %36, %135 : vector<2x16x16xf32>
    %cst_43 = arith.constant 0.000000e+00 : f32
    %137 = vector.broadcast %cst_43 : f32 to vector<2x16x16xf32>
    %138 = arith.cmpf oeq, %136, %137 : vector<2x16x16xf32>
    %cst_44 = arith.constant -1.000000e+20 : f32
    %139 = vector.broadcast %cst_44 : f32 to vector<2x16x16xf32>
    %140 = arith.select %138, %139, %136 : vector<2x16x16xi1>, vector<2x16x16xf32>
    %cst_45 = arith.constant dense<0xFF800000> : vector<2x16xf32>
    %141 = vector.multi_reduction <maximumf>, %140, %cst_45 [2] : vector<2x16x16xf32> to vector<2x16xf32>
    %142 = vector.shape_cast %141 : vector<2x16xf32> to vector<2x16x1xf32>
    %143 = vector.broadcast %142 : vector<2x16x1xf32> to vector<2x16x16xf32>
    %144 = arith.subf %140, %143 : vector<2x16x16xf32>
    %145 = math.exp %144 : vector<2x16x16xf32>
    %cst_46 = arith.constant dense<0.000000e+00> : vector<2x16xf32>
    %146 = vector.multi_reduction <add>, %145, %cst_46 [2] : vector<2x16x16xf32> to vector<2x16xf32>
    %147 = vector.shape_cast %146 : vector<2x16xf32> to vector<2x16x1xf32>
    %148 = vector.broadcast %147 : vector<2x16x1xf32> to vector<2x16x16xf32>
    %149 = arith.divf %145, %148 : vector<2x16x16xf32>
    %c0_47 = arith.constant 0 : index
    %c0_48 = arith.constant 0 : index
    %c0_49 = arith.constant 0 : index
    %150 = vector.load %arg5[%c0_47, %c0_48, %c0_49] : memref<2x1x16xf32, #tpu.memory_space<vmem>>, vector<2x1x16xf32>
    %cst_50 = arith.constant 1.600000e+04 : f32
    %151 = vector.broadcast %cst_50 : f32 to vector<2x1x16xf32>
    %152 = arith.mulf %150, %151 : vector<2x1x16xf32>
    %153 = vector.broadcast %152 : vector<2x1x16xf32> to vector<2x16x16xf32>
    %154 = arith.mulf %149, %153 : vector<2x16x16xf32>
    %cst_51 = arith.constant dense<0.000000e+00> : vector<2x16xf32>
    %155 = vector.multi_reduction <add>, %154, %cst_51 [2] : vector<2x16x16xf32> to vector<2x16xf32>
    %156 = tpu.iota {dimensions = array<i32: 0>} : vector<16x16xi32>
    %157 = tpu.iota {dimensions = array<i32: 1>} : vector<16x16xi32>
    %158 = arith.cmpi eq, %156, %157 : vector<16x16xi32>
    %159 = arith.extui %158 : vector<16x16xi1> to vector<16x16xi32>
    %160 = arith.sitofp %159 : vector<16x16xi32> to vector<16x16xf32>
    %c1_i32 = arith.constant 1 : i32
    %161 = vector.broadcast %c1_i32 : i32 to vector<16x16xi32>
    %162 = arith.addi %157, %161 : vector<16x16xi32>
    %163 = arith.cmpi eq, %156, %162 : vector<16x16xi32>
    %164 = arith.extui %163 : vector<16x16xi1> to vector<16x16xi32>
    %165 = arith.sitofp %164 : vector<16x16xi32> to vector<16x16xf32>
    %166 = arith.subf %160, %165 : vector<16x16xf32>
    %cst_52 = arith.constant dense<0.000000e+00> : vector<2x16xf32>
    %167 = tpu.matmul %155, %166, %cst_52 {dimension_numbers = #tpu.dot_dimension_numbers<[1], [0], [0], [1], [0, 0, 1, 1], [], []>} : vector<2x16xf32>, vector<16x16xf32>, vector<2x16xf32> -> vector<2x16xf32>
    %168 = math.absf %167 : vector<2x16xf32>
    %cst_53 = arith.constant 1.000000e+00 : f32
    %169 = vector.broadcast %cst_53 : f32 to vector<2x16xf32>
    %170 = arith.cmpf olt, %168, %169 : vector<2x16xf32>
    %cst_54 = arith.constant 5.000000e-01 : f32
    %171 = vector.broadcast %cst_54 : f32 to vector<2x16xf32>
    %172 = arith.mulf %171, %167 : vector<2x16xf32>
    %173 = arith.mulf %172, %167 : vector<2x16xf32>
    %cst_55 = arith.constant 5.000000e-01 : f32
    %174 = vector.broadcast %cst_55 : f32 to vector<2x16xf32>
    %175 = arith.subf %168, %174 : vector<2x16xf32>
    %176 = arith.select %170, %173, %175 : vector<2x16xi1>, vector<2x16xf32>
    %177 = tpu.iota {dimensions = array<i32: 1>} : vector<2x16xi32>
    %c2_i32_56 = arith.constant 2 : i32
    %178 = vector.broadcast %c2_i32_56 : i32 to vector<2x16xi32>
    %179 = arith.cmpi sge, %177, %178 : vector<2x16xi32>
    %c12_i32 = arith.constant 12 : i32
    %180 = vector.broadcast %c12_i32 : i32 to vector<2x16xi32>
    %181 = arith.cmpi sle, %177, %180 : vector<2x16xi32>
    %182 = arith.andi %179, %181 : vector<2x16xi1>
    %183 = vector.broadcast %5 : vector<2x1xi1> to vector<2x16xi1>
    %184 = arith.andi %182, %183 : vector<2x16xi1>
    %cst_57 = arith.constant 0.000000e+00 : f32
    %185 = vector.broadcast %cst_57 : f32 to vector<2x16xf32>
    %186 = arith.select %184, %176, %185 : vector<2x16xi1>, vector<2x16xf32>
    %187 = vector.shape_cast %186 : vector<2x16xf32> to vector<1x2x16xf32>
    %cst_58 = arith.constant dense<0.000000e+00> : vector<1xf32>
    %188 = vector.multi_reduction <add>, %187, %cst_58 [1, 2] : vector<1x2x16xf32> to vector<1xf32>
    %189 = vector.shape_cast %188 : vector<1xf32> to vector<1x1x1xf32>
    %190 = vector.extract %189[0, 0, 0] : f32 from vector<1x1x1xf32>
    %c0_59 = arith.constant 0 : index
    %c0_60 = arith.constant 0 : index
    %191 = memref.load %arg6[%c0_59, %c0_60] : memref<1x3xf32, #tpu.memory_space<smem>>
    memref.store %107, %arg6[%c0_59, %c0_60] : memref<1x3xf32, #tpu.memory_space<smem>>
    %c0_61 = arith.constant 0 : index
    %c1 = arith.constant 1 : index
    %192 = memref.load %arg6[%c0_61, %c1] : memref<1x3xf32, #tpu.memory_space<smem>>
    memref.store %129, %arg6[%c0_61, %c1] : memref<1x3xf32, #tpu.memory_space<smem>>
    %c0_62 = arith.constant 0 : index
    %c2 = arith.constant 2 : index
    %193 = memref.load %arg6[%c0_62, %c2] : memref<1x3xf32, #tpu.memory_space<smem>>
    memref.store %190, %arg6[%c0_62, %c2] : memref<1x3xf32, #tpu.memory_space<smem>>
    return
  }
  func.func @transform_0(%arg0: i32) -> (i32, i32, i32) {
    %c0_i32 = arith.constant 0 : i32
    %c0_i32_0 = arith.constant 0 : i32
    %c0_i32_1 = arith.constant 0 : i32
    return %arg0, %c0_i32, %c0_i32_0 : i32, i32, i32
  }
  func.func @transform_1(%arg0: i32) -> (i32, i32, i32) {
    %c0_i32 = arith.constant 0 : i32
    %c0_i32_0 = arith.constant 0 : i32
    %c0_i32_1 = arith.constant 0 : i32
    return %arg0, %c0_i32, %c0_i32_0 : i32, i32, i32
  }
  func.func @transform_2(%arg0: i32) -> (i32, i32, i32) {
    %c0_i32 = arith.constant 0 : i32
    %c0_i32_0 = arith.constant 0 : i32
    %c0_i32_1 = arith.constant 0 : i32
    return %arg0, %c0_i32, %c0_i32_0 : i32, i32, i32
  }
  func.func @transform_3(%arg0: i32) -> (i32, i32) {
    %c0_i32 = arith.constant 0 : i32
    %c0_i32_0 = arith.constant 0 : i32
    return %arg0, %c0_i32 : i32, i32
  }
  func.func @transform_4(%arg0: i32) -> (i32, i32, i32) {
    %c0_i32 = arith.constant 0 : i32
    %c0_i32_0 = arith.constant 0 : i32
    %c0_i32_1 = arith.constant 0 : i32
    return %arg0, %c0_i32, %c0_i32_0 : i32, i32, i32
  }
  func.func @transform_5(%arg0: i32) -> (i32, i32) {
    %c0_i32 = arith.constant 0 : i32
    %c0_i32_0 = arith.constant 0 : i32
    return %arg0, %c0_i32 : i32, i32
  }
}

</mosaic_0001>

<bundles_post_ra>
// kernel: tpu_custom_call.1
= control target key start
LH: loop header
LB: loop body
LE: loop exit
PB: predicated region body
PF: predicated region fallthrough
CT: control target
= control target key end

     0   :  { %10 = vsyncpa [#allocation3], 0  ;;  %s2563_s0 = inlined_call_operand.hbm [shape: f32[2,16,32], index: 0, kind: input, shape index: {}]   ;;  %s2564_s1 = inlined_call_operand.hbm [shape: f32[2,16,32], index: 1, kind: input, shape index: {}]   ;;  %s2565_s2 = inlined_call_operand.hbm [shape: f32[2,16,32], index: 2, kind: input, shape index: {}]   ;;  %s2566_s3 = inlined_call_operand.vmem [shape: s32[2,1], index: 3, kind: input, shape index: {}]   ;;  %s2567_s4 = inlined_call_operand.vmem [shape: f32[2,1,16], index: 4, kind: input, shape index: {}]   ;;  %s2568_s5 = inlined_call_operand.hbm [shape: f32[1,3], index: 5, kind: output, shape index: {}]  }
   0x1   :  { %11 = vsyncpa [#allocation6], 0 }
   0x2   :  { %12 = vsyncpa [#allocation4], 0  ;;  %s1951_s18 = smov [#allocation5]   ;;  %s1952_s20 = smov [#allocation2]  }
   0x3   :  { %s30_s19 = sshll.u32 %s1951_s18, 4  ;;  %s18_s21 = sshll.u32 %s1952_s20, 4  ;;  %s31_s19 = int_to_ptr.vmem [resolvable:$true] %s30_s19  ;;  %s19_s21 = int_to_ptr.vmem [resolvable:$true] %s18_s21 }
   0x4   :  { %s1885_s22 = scalar_lea.vmem %s31_s19, 512  ;;  %p1890_p1 = scmp.lt.s32.totalorder %s31_s19, %s31_s19 }
   0x5   :  { %p1886_p0 = scmp.ne.s32.totalorder %s31_s19, %s1885_s22  ;;  %p1891_p2 = scmp.lt.s32.totalorder %s1885_s22, %s1885_s22 }
   0x7   :  { %p1892_p3 = por %p1891_p2, %p1890_p1 }
   0x9   :  { %p1893_p4 = pnand %p1892_p3, %p1886_p0 }
   0xb   :  { %1896 = shalt.err (!%p1893_p4)
}
   0xc   :  { %s1953_s23 = smov 128   ;;  %s1954_s24 = smov 8  }
   0xd   :  { %36 = dma.hbm_to_vmem [thread:$0]  %s2564_s1, 512, %s31_s19, [#allocation6], %s1953_s23, %s1953_s23, %s1954_s24  }
   0xe   :  { %s1905_s27 = scalar_lea.vmem %s19_s21, 512  ;;  %p1910_p6 = scmp.lt.s32.totalorder %s19_s21, %s19_s21 }
   0xf   :  { %p1906_p5 = scmp.ne.s32.totalorder %s19_s21, %s1905_s27  ;;  %p1911_p7 = scmp.lt.s32.totalorder %s1905_s27, %s1905_s27 }
  0x11   :  { %p1912_p8 = por %p1911_p7, %p1910_p6 }
  0x13   :  { %p1913_p9 = pnand %p1912_p8, %p1906_p5 }
  0x15   :  { %1916 = shalt.err (!%p1913_p9)
}
  0x16   :  { %24 = dma.hbm_to_vmem [thread:$0]  %s2563_s0, 512, %s19_s21, [#allocation3], %s1953_s23, %s1953_s23, %s1954_s24  }
  0x17   :  { %s1955_s30 = smov [#allocation7]  }
  0x18   :  { %s42_s6 = sshll.u32 %s1955_s30, 4  ;;  %s43_s6 = int_to_ptr.vmem [resolvable:$true] %s42_s6 }
  0x19   :  { %s1925_s7 = scalar_lea.vmem %s43_s6, 512  ;;  %p1930_p11 = scmp.lt.s32.totalorder %s43_s6, %s43_s6 }
  0x1a   :  { %p1926_p10 = scmp.ne.s32.totalorder %s43_s6, %s1925_s7  ;;  %p1931_p12 = scmp.lt.s32.totalorder %s1925_s7, %s1925_s7 }
  0x1c   :  { %p1932_p13 = por %p1931_p12, %p1930_p11 }
  0x1e   :  { %p1933_p0 = pnand %p1932_p13, %p1926_p10 }
  0x20   :  { %1936 = shalt.err (!%p1933_p0)
}
  0x21   :  { %48 = dma.hbm_to_vmem [thread:$0]  %s2565_s2, 512, %s43_s6, [#allocation6], %s1953_s23, %s1953_s23, %s1954_s24  }
  0x22   :  { %1945 = dma.done.wait [#allocation3], 512  }
  0x23   :  { %1946 = vsyncadd [#allocation3], 4294966784 }
  0x24   :  { %1947 = dma.done.wait [#allocation6], 1024  }
  0x25   :  { %1948 = vsyncadd [#allocation6], 4294966272  ;;  %vm87_vm0 = vcmask 261120   ;;  %v2000_v0 = vld [vmem:[#allocation5 + $0x8] sm:$0xff]  ;;  %v2002_v1 = vld [vmem:[#allocation5] sm:$0xff]  ;;  %s1960_s14 = smov [#allocation8]  }
  0x26   :  { %v2004_v2 = vld [vmem:[#allocation5 + $0x18] sm:$0xff]  ;;  %v145_v3 = vmul.f32 %v2000_v0, %v2000_v0  ;;  %v144_v4 = vmul.f32 %v2002_v1, %v2002_v1  ;;  %v2012_v6 = vld [vmem:[#allocation5 + $0x10] sm:$0xff]  ;;  %v2016_v8 = vld [vmem:[#allocation7 + $0x8] sm:$0xff] }
  0x27   :  { %v147_v5 = vmul.f32 %v2004_v2, %v2004_v2  ;;  %v146_v7 = vmul.f32 %v2012_v6, %v2012_v6  ;;  %v2018_v9 = vld [vmem:[#allocation2] sm:$0xff]  ;;  %v205_v14 = vmul.f32 %v2016_v8, %v2016_v8  ;;  %v2028_v16 = vld [vmem:[#allocation2 + $0x10] sm:$0xff]  ;;  %v2030_v17 = vld [vmem:[#allocation2 + $0x8] sm:$0xff] }
  0x28   :  { %v151_v10 = vsel %vm87_vm0, %v145_v3, 0.0  ;;  %v148_v11 = vsel %vm87_vm0, %v144_v4, 0.0  ;;  %v83_v15 = vmul.f32 %v2018_v9, %v2018_v9  ;;  %v85_v20 = vmul.f32 %v2028_v16, %v2028_v16  ;;  %v2038_v22 = vld [vmem:[#allocation2 + $0x18] sm:$0xff]  ;;  %v2048_v28 = vld [vmem:[#allocation7 + $0x10] sm:$0xff]  ;;  %v2050_v29 = vld [vmem:[#allocation7] sm:$0xff] }
  0x29   :  { %152 = vadd.xlane.f32.xlu0 %v151_v10  ;;  %149 = vadd.xlane.f32.xlu1 %v148_v11  ;;  %v157_v12 = vsel %vm87_vm0, %v147_v5, 0.0  ;;  %v154_v13 = vsel %vm87_vm0, %v146_v7, 0.0  ;;  %v211_v18 = vsel %vm87_vm0, %v205_v14, 0.0  ;;  %v84_v21 = vmul.f32 %v2030_v17, %v2030_v17  ;;  %v2040_v23 = vld [vmem:[#allocation7 + $0x18] sm:$0xff] }
  0x2a   :  { %v88_v19 = vsel %vm87_vm0, %v83_v15, 0.0  ;;  %v94_v24 = vsel %vm87_vm0, %v85_v20, 0.0  ;;  %v86_v26 = vmul.f32 %v2038_v22, %v2038_v22  ;;  %v207_v27 = vmul.f32 %v2040_v23, %v2040_v23 }
  0x2b   :  { %v91_v25 = vsel %vm87_vm0, %v84_v21, 0.0  ;;  %v206_v32 = vmul.f32 %v2048_v28, %v2048_v28  ;;  %v204_v33 = vmul.f32 %v2050_v29, %v2050_v29 }
  0x2c   :  { %v97_v30 = vsel %vm87_vm0, %v86_v26, 0.0  ;;  %v217_v31 = vsel %vm87_vm0, %v207_v27, 0.0 }
  0x2d   :  { %158 = vadd.xlane.f32.xlu0 %v157_v12  ;;  %155 = vadd.xlane.f32.xlu1 %v154_v13  ;;  %v214_v34 = vsel %vm87_vm0, %v206_v32, 0.0  ;;  %v208_v35 = vsel %vm87_vm0, %v204_v33, 0.0 }
  0x31   :  { %212 = vadd.xlane.f32.xlu1 %v211_v18  ;;  %89 = vadd.xlane.f32.xlu0 %v88_v19 }
  0x35   :  { %95 = vadd.xlane.f32.xlu1 %v94_v24  ;;  %92 = vadd.xlane.f32.xlu0 %v91_v25 }
  0x39   :  { %98 = vadd.xlane.f32.xlu1 %v97_v30  ;;  %218 = vadd.xlane.f32.xlu0 %v217_v31 }
  0x3d   :  { %215 = vadd.xlane.f32.xlu1 %v214_v34  ;;  %209 = vadd.xlane.f32.xlu0 %v208_v35 }
  0xb2   :  { %v153_v36 = vpop.xlane.xlu0 %152  ;;  %v150_v37 = vpop.xlane.xlu1 %149 }
  0xb3   :  { %1725 = vrsqrt.f32 %v153_v36  ;;  %vm169_vm1 = vcmp.eq.f32.partialorder %v153_v36, inf  ;;  %vm171_vm2 = vcmp.eq.f32.partialorder %v153_v36, 0.0  ;;  %v172_v47 = vand.u32 2147483648, %v153_v36 }
  0xb4   :  { %1727 = vrsqrt.f32 %v150_v37  ;;  %vm162_vm3 = vcmp.eq.f32.partialorder %v150_v37, inf  ;;  %vm164_vm4 = vcmp.eq.f32.partialorder %v150_v37, 0.0  ;;  %v165_v52 = vand.u32 2147483648, %v150_v37 }
  0xb6   :  { %v159_v38 = vpop.xlane.xlu0 %158  ;;  %v156_v39 = vpop.xlane.xlu1 %155 }
  0xb7   :  { %1729 = vrsqrt.f32 %v159_v38  ;;  %vm183_vm5 = vcmp.eq.f32.partialorder %v159_v38, inf  ;;  %vm185_vm6 = vcmp.eq.f32.partialorder %v159_v38, 0.0  ;;  %v186_v60 = vand.u32 2147483648, %v159_v38 }
  0xb8   :  { %1731 = vrsqrt.f32 %v156_v39  ;;  %vm176_vm7 = vcmp.eq.f32.partialorder %v156_v39, inf  ;;  %vm178_vm8 = vcmp.eq.f32.partialorder %v156_v39, 0.0  ;;  %v179_v4 = vand.u32 2147483648, %v156_v39 }
  0xba   :  { %v2060_v40 = vpop.xlane.xlu1 %212  ;;  %v2062_v41 = vpop.xlane.xlu0 %89 }
  0xbb   :  { %1733 = vrsqrt.f32 %v2060_v40  ;;  %vm229_vm9 = vcmp.eq.f32.partialorder %v2060_v40, inf  ;;  %vm231_vm10 = vcmp.eq.f32.partialorder %v2060_v40, 0.0  ;;  %v232_v19 = vand.u32 2147483648, %v2060_v40 }
  0xbc   :  { %1735 = vrsqrt.f32 %v2062_v41  ;;  %vm102_vm11 = vcmp.eq.f32.partialorder %v2062_v41, inf  ;;  %v105_v24 = vand.u32 2147483648, %v2062_v41  ;;  %vm104_vm12 = vcmp.eq.f32.partialorder %v2062_v41, 0.0 }
  0xbe   :  { %v2066_v42 = vpop.xlane.xlu1 %95  ;;  %v2068_v43 = vpop.xlane.xlu0 %92 }
  0xbf   :  { %1737 = vrsqrt.f32 %v2066_v42  ;;  %vm116_vm13 = vcmp.eq.f32.partialorder %v2066_v42, inf  ;;  %vm118_vm14 = vcmp.eq.f32.partialorder %v2066_v42, 0.0  ;;  %v119_v35 = vand.u32 2147483648, %v2066_v42 }
  0xc0   :  { %v1726_v44 = vpop.eup %1725  ;;  %1739 = vrsqrt.f32 %v2068_v43  ;;  %vm109_vm15 = vcmp.eq.f32.partialorder %v2068_v43, inf }
  0xc1   :  { %v1728_v45 = vpop.eup %1727  ;;  %v168_v46 = vmul.f32 %v1726_v44, %v153_v36 }
  0xc2   :  { %v161_v48 = vmul.f32 %v1728_v45, %v150_v37  ;;  %v2072_v49 = vpop.xlane.xlu1 %98  ;;  %v2074_v50 = vpop.xlane.xlu0 %218 }
  0xc3   :  { %v170_v51 = vsel %vm169_vm1, %v153_v36, %v168_v46  ;;  %1741 = vrsqrt.f32 %v2072_v49  ;;  %vm111_vm1 = vcmp.eq.f32.partialorder %v2068_v43, 0.0 }
  0xc4   :  { %v1730_v53 = vpop.eup %1729  ;;  %v173_v54 = vsel %vm171_vm2, %v172_v47, %v170_v51  ;;  %v163_v55 = vsel %vm162_vm3, %v150_v37, %v161_v48  ;;  %1743 = vrsqrt.f32 %v2074_v50  ;;  %vm123_vm2 = vcmp.eq.f32.partialorder %v2072_v49, inf }
  0xc5   :  { %v1732_v56 = vpop.eup %1731  ;;  %v189_v57 = vmax.f32 %v173_v54, 1e-12  ;;  %v166_v58 = vsel %vm164_vm4, %v165_v52, %v163_v55  ;;  %v182_v59 = vmul.f32 %v1730_v53, %v159_v38  ;;  %vm125_vm3 = vcmp.eq.f32.partialorder %v2072_v49, 0.0 }
  0xc6   :  { %v188_v61 = vmax.f32 %v166_v58, 1e-12  ;;  %v175_v62 = vmul.f32 %v1732_v56, %v156_v39  ;;  %v2078_v63 = vpop.xlane.xlu1 %215  ;;  %v2082_v5 = vpop.xlane.xlu0 %209  ;;  %vm243_vm4 = vcmp.eq.f32.partialorder %v2074_v50, inf }
  0xc7   :  { %1745 = vrcp.f32 %v189_v57  ;;  %v184_v3 = vsel %vm183_vm5, %v159_v38, %v182_v59  ;;  %v112_v38 = vand.u32 2147483648, %v2068_v43  ;;  %vm245_vm5 = vcmp.eq.f32.partialorder %v2074_v50, 0.0 }
  0xc8   :  { %v1734_v7 = vpop.eup %1733  ;;  %1747 = vrcp.f32 %v188_v61  ;;  %v187_v10 = vsel %vm185_vm6, %v186_v60, %v184_v3  ;;  %v177_v11 = vsel %vm176_vm7, %v156_v39, %v175_v62  ;;  %vm236_vm6 = vcmp.eq.f32.partialorder %v2078_v63, inf }
  0xc9   :  { %v1736_v12 = vpop.eup %1735  ;;  %v191_v13 = vmax.f32 %v187_v10, 1e-12  ;;  %v180_v14 = vsel %vm178_vm8, %v179_v4, %v177_v11  ;;  %v228_v15 = vmul.f32 %v1734_v7, %v2060_v40  ;;  %1749 = vrsqrt.f32 %v2078_v63 }
  0xca   :  { %v190_v18 = vmax.f32 %v180_v14, 1e-12  ;;  %v101_v20 = vmul.f32 %v1736_v12, %v2062_v41  ;;  %1751 = vrsqrt.f32 %v2082_v5  ;;  %vm238_vm7 = vcmp.eq.f32.partialorder %v2078_v63, 0.0 }
  0xcb   :  { %1753 = vrcp.f32 %v191_v13  ;;  %v230_v21 = vsel %vm229_vm9, %v2060_v40, %v228_v15  ;;  %vm222_vm8 = vcmp.eq.f32.partialorder %v2082_v5, inf  ;;  %v225_v11 = vand.u32 2147483648, %v2082_v5 }
  0xcc   :  { %v1738_v25 = vpop.eup %1737  ;;  %1755 = vrcp.f32 %v190_v18  ;;  %v233_v26 = vsel %vm231_vm10, %v232_v19, %v230_v21  ;;  %v103_v27 = vsel %vm102_vm11, %v2062_v41, %v101_v20  ;;  %vm224_vm9 = vcmp.eq.f32.partialorder %v2082_v5, 0.0 }
  0xcd   :  { %v1740_v30 = vpop.eup %1739  ;;  %v249_v31 = vmax.f32 %v233_v26, 1e-12  ;;  %v106_v32 = vsel %vm104_vm12, %v105_v24, %v103_v27  ;;  %v115_v33 = vmul.f32 %v1738_v25, %v2066_v42  ;;  %vm605_vm10 = vcmask 130048  }
  0xce   :  { %v128_v34 = vmax.f32 %v106_v32, 1e-12  ;;  %v108_v36 = vmul.f32 %v1740_v30, %v2068_v43 }
  0xcf   :  { %1757 = vrcp.f32 %v249_v31  ;;  %v117_v37 = vsel %vm116_vm13, %v2066_v42, %v115_v33  ;;  %v126_v42 = vand.u32 2147483648, %v2072_v49 }
  0xd0   :  { %v1742_v39 = vpop.eup %1741  ;;  %1759 = vrcp.f32 %v128_v34  ;;  %v120_v40 = vsel %vm118_vm14, %v119_v35, %v117_v37  ;;  %v110_v41 = vsel %vm109_vm15, %v2068_v43, %v108_v36  ;;  %v246_v43 = vand.u32 2147483648, %v2074_v50 }
  0xd1   :  { %v1744_v44 = vpop.eup %1743  ;;  %v130_v45 = vmax.f32 %v120_v40, 1e-12  ;;  %v113_v46 = vsel %vm111_vm1, %v112_v38, %v110_v41  ;;  %v122_v47 = vmul.f32 %v1742_v39, %v2072_v49 }
  0xd2   :  { %v129_v48 = vmax.f32 %v113_v46, 1e-12  ;;  %v242_v51 = vmul.f32 %v1744_v44, %v2074_v50 }
  0xd3   :  { %1761 = vrcp.f32 %v130_v45  ;;  %v124_v52 = vsel %vm123_vm2, %v2072_v49, %v122_v47 }
  0xd4   :  { %v1746_v53 = vpop.eup %1745  ;;  %1763 = vrcp.f32 %v129_v48  ;;  %v127_v54 = vsel %vm125_vm3, %v126_v42, %v124_v52  ;;  %v244_v55 = vsel %vm243_vm4, %v2074_v50, %v242_v51 }
  0xd5   :  { %v1748_v56 = vpop.eup %1747  ;;  %v131_v57 = vmax.f32 %v127_v54, 1e-12  ;;  %v247_v58 = vsel %vm245_vm5, %v246_v43, %v244_v55  ;;  %v2121_v59 = vmul.f32 %v1746_v53, %v2000_v0  ;;  %v239_v0 = vand.u32 2147483648, %v2078_v63 }
  0xd6   :  { %v1750_v60 = vpop.eup %1749  ;;  %v251_v61 = vmax.f32 %v247_v58, 1e-12  ;;  %v193_v3 = vmul.f32 %v1748_v56, %v2002_v1  ;;  %vm1958_vm5 = vmmov 0  }
  0xd7   :  { %v1752_v49 = vpop.eup %1751  ;;  %1765 = vrcp.f32 %v131_v57  ;;  %v235_v62 = vmul.f32 %v1750_v60, %v2078_v63  ;;  %1644 = vmatprep.subr.msk.mxu0 %vm87_vm0, %v2121_v59  ;;  %v62_v60 = vlaneseq }
  0xd8   :  { %v1754_v50 = vpop.eup %1753  ;;  %1767 = vrcp.f32 %v251_v61  ;;  %v221_v4 = vmul.f32 %v1752_v49, %v2082_v5  ;;  %1645 = vmatpush3.xpose.msk.msra.mxu0 %vm87_vm0, %v2121_v59 }
  0xd9   :  { %v1756_v7 = vpop.eup %1755  ;;  %v237_v10 = vsel %vm236_vm6, %v2078_v63, %v235_v62  ;;  %1646 = vmatprep.subr.msk.mxu0 %vm87_vm0, %v193_v3  ;;  %v199_v1 = vmul.f32 %v1754_v50, %v2004_v2  ;;  %v2199_v61 = vshrl.u32 %v62_v60, 7  ;;  %v2201_v62 = vand.u32 127, %v62_v60 }
  0xda   :  { %v240_v12 = vsel %vm238_vm7, %v239_v0, %v237_v10  ;;  %v223_v13 = vsel %vm222_vm8, %v2082_v5, %v221_v4  ;;  %v197_v18 = vmul.f32 %v1756_v7, %v2012_v6  ;;  %vm1445_vm6 = vcmask 130112  }
  0xdb   :  { %v250_v14 = vmax.f32 %v240_v12, 1e-12  ;;  %v226_v15 = vsel %vm224_vm9, %v225_v11, %v223_v13  ;;  %1651 = vmatprep.subr.msk.mxu1 %vm87_vm0, %v199_v1  ;;  %v1317_v4 = vsub.s32 %v2199_v61, %v2201_v62  ;;  %vm2324_vm3 = vcmp.eq.s32.totalorder %v2199_v61, %v2201_v62 }
  0xdc   :  { %v1758_v63 = vpop.eup %1757  ;;  %v248_v19 = vmax.f32 %v226_v15, 1e-12  ;;  %1647 = vmatpush3.xpose.msk.msra.mxu0 %vm87_vm0, %v193_v3  ;;  %1652 = vmatpush3.xpose.msk.msra.mxu1 %vm87_vm0, %v199_v1  ;;  %vm1456_vm7 = vcmask 1041409  }
  0xdd   :  { %v1760_v20 = vpop.eup %1759  ;;  %1769 = vrcp.f32 %v250_v14  ;;  %1653 = vmatprep.subr.msk.mxu1 %vm87_vm0, %v197_v18  ;;  %v255_v2 = vmul.f32 %v1758_v63, %v2016_v8 }
  0xde   :  { %1771 = vrcp.f32 %v248_v19  ;;  %v133_v5 = vmul.f32 %v1760_v20, %v2018_v9  ;;  %v1320_v19 = vsub.s32 0, %v1317_v4 }
  0xdf   :  { %1658 = vmatprep.subr.msk.mxu0 %vm87_vm0, %v255_v2 }
  0xe0   :  { %v1762_v21 = vpop.eup %1761  ;;  %1648 = vmatprep.mubr.msk.f32.mxu0 %vm87_vm0, %v133_v5  ;;  %1654 = vmatpush3.xpose.msk.msra.mxu1 %vm87_vm0, %v197_v18 }
  0xe1   :  { %v1764_v6 = vpop.eup %1763  ;;  %v137_v24 = vmul.f32 %v1762_v21, %v2028_v16 }
  0xe2   :  { %v135_v25 = vmul.f32 %v1764_v6, %v2030_v17 }
  0xe3   :  { %1655 = vmatprep.mubr.msk.f32.mxu1 %vm87_vm0, %v137_v24 }
  0xe4   :  { %v1766_v26 = vpop.eup %1765  ;;  %1649 = vmatmul.mubr.msk.f32.vlgmr.msra.gmra.mxu0 %vm87_vm0, %v135_v25 }
  0xe5   :  { %v1768_v8 = vpop.eup %1767  ;;  %1659 = vmatpush3.xpose.msk.msra.mxu0 %vm87_vm0, %v255_v2  ;;  %1662 = vmatprep.mubr.msk.f32.mxu0 %vm87_vm0, %v193_v3  ;;  %v139_v9 = vmul.f32 %v1766_v26, %v2038_v22  ;;  %v2204_v3 = vadd.s32 8, %v2199_v61 }
  0xe6   :  { %v259_v27 = vmul.f32 %v1768_v8, %v2040_v23 }
  0xe7   :  { %1656 = vmatmul.mubr.msk.f32.vlgmr.msra.gmra.mxu1 %vm87_vm0, %v139_v9  ;;  %v1318_v12 = vsub.s32 %v2204_v3, %v2201_v62  ;;  %vm2313_vm1 = vcmp.eq.s32.totalorder %v2204_v3, %v2201_v62 }
  0xe8   :  { %1665 = vmatprep.subr.msk.mxu1 %vm87_vm0, %v259_v27  ;;  %1669 = vmatprep.mubr.msk.f32.mxu1 %vm87_vm0, %v197_v18 }
  0xe9   :  { %1666 = vmatpush3.xpose.msk.msra.mxu1 %vm87_vm0, %v259_v27  ;;  %v1323_v25 = vsub.s32 0, %v1318_v12  ;;  %v1599_v27 = vmin.u32 %v1320_v19, %v1317_v4 }
  0xea   :  { %v1770_v16 = vpop.eup %1769 }
  0xeb   :  { %v1772_v17 = vpop.eup %1771  ;;  %v257_v30 = vmul.f32 %v1770_v16, %v2048_v28 }
  0xec   :  { %v253_v31 = vmul.f32 %v1772_v17, %v2050_v29  ;;  %v1600_v17 = vmin.u32 %v1323_v25, %v1318_v12 }
  0xed   :  { %1667 = vmatprep.subr.msk.mxu1 %vm87_vm0, %v257_v30 }
  0xee   :  { %1660 = vmatprep.subr.msk.mxu0 %vm87_vm0, %v253_v31  ;;  %1668 = vmatpush3.xpose.msk.msra.mxu1 %vm87_vm0, %v257_v30  ;;  %vm1326_vm11 = vcmp.le.s32.totalorder %v1600_v17, 2 }
  0xef   :  { %1661 = vmatpush3.xpose.msk.msra.mxu0 %vm87_vm0, %v253_v31  ;;  %v1956_v31 = vmov 0.0  }
  0xf1   :  { %1670 = vmatmul.mubr.msk.f32.vlgmr.msra.gmra.mxu1 %vm87_vm0, %v199_v1 }
  0xf2   :  { %1663 = vmatmul.mubr.msk.f32.vlgmr.msra.gmra.mxu0 %vm87_vm0, %v2121_v59  ;;  %vm1325_vm0 = vcmp.le.s32.totalorder %v1599_v27, 2 }
 0x1a4   :  { %v1650_v22 = vpop.f32.mrf.mxu0 }
 0x1a5   :  { %v2171_v23 = vmul.f32 20.0, %v1650_v22  ;;  %v1601_v22 = vsel %vm1325_vm0, 1.0, %v1956_v31 }
 0x1a6   :  { %v338_v28 = vpop.f32.mrf.mxu0 }
 0x1a7   :  { %v2173_v32 = vmul.f32 20.0, %v338_v28  ;;  %v609_v29 = vsel %vm605_vm10, %v2171_v23, -inf  ;;  %v1657_v34 = vpop.f32.mrf.mxu1 }
 0x1a8   :  { %610 = vmax.xlane.f32.xlu0 %v609_v29  ;;  %v2184_v51 = vmul.f32 20.0, %v1657_v34 }
 0x1a9   :  { %v606_v33 = vsel %vm605_vm10, %v2173_v32, -inf  ;;  %v425_v35 = vpop.f32.mrf.mxu1 }
 0x1aa   :  { %607 = vmax.xlane.f32.xlu1 %v606_v33  ;;  %v2181_v48 = vmul.f32 20.0, %v425_v35  ;;  %v615_v53 = vsel %vm605_vm10, %v2184_v51, -inf  ;;  %v1602_v33 = vsel %vm1326_vm11, 1.0, %v1956_v31  ;;  %v1331_v35 = vmul.f32 %v1601_v22, %v2173_v32 }
 0x1ac   :  { %v612_v43 = vsel %vm605_vm10, %v2181_v48, -inf  ;;  %vm1335_vm12 = vcmp.eq.f32.partialorder %v1331_v35, 0.0 }
 0x1b1   :  { %v1671_v36 = vpop.f32.mrf.mxu1 }
 0x1b2   :  { %v1664_v37 = vpop.f32.mrf.mxu0  ;;  %v604_v41 = vmul.f32 20.0, %v1671_v36 }
 0x1b3   :  { %v602_v38 = vmul.f32 20.0, %v1664_v37  ;;  %v592_v40 = vpop.f32.mrf.mxu1 }
 0x1b4   :  { %v511_v39 = vpop.f32.mrf.mxu0  ;;  %v603_v46 = vmul.f32 20.0, %v592_v40  ;;  %v671_v42 = vsel %vm605_vm10, %v604_v41, -inf }
 0x1b5   :  { %v601_v44 = vmul.f32 20.0, %v511_v39  ;;  %v665_v45 = vsel %vm605_vm10, %v602_v38, -inf }
 0x1b6   :  { %666 = vmax.xlane.f32.xlu0 %v665_v45  ;;  %v668_v52 = vsel %vm605_vm10, %v603_v46, -inf }
 0x1b7   :  { %v662_v47 = vsel %vm605_vm10, %v601_v44, -inf }
 0x1b8   :  { %663 = vmax.xlane.f32.xlu1 %v662_v47 }
 0x1ba   :  { %672 = vmax.xlane.f32.xlu0 %v671_v42  ;;  %v1339_v42 = vsel %vm1335_vm12, -1e+20, %v1331_v35 }
 0x1bc   :  { %669 = vmax.xlane.f32.xlu1 %v668_v52 }
 0x1be   :  { %613 = vmax.xlane.f32.xlu0 %v612_v43 }
 0x1c0   :  { %616 = vmax.xlane.f32.xlu1 %v615_v53  ;;  %v1343_v53 = vsel %vm605_vm10, %v1339_v42, -inf }
 0x231   :  { %v2191_v54 = vpop.xlane.xlu0 %610 }
 0x232   :  { %v619_v55 = vsub.f32 %v2171_v23, %v2191_v54 }
 0x233   :  { %v2195_v56 = vpop.xlane.xlu1 %607 }
 0x234   :  { %v624_v57 = vmul.f32 1.442695, %v619_v55  ;;  %v618_v58 = vsub.f32 %v2173_v32, %v2195_v56 }
 0x236   :  { %1773 = vpow2.f32 %v624_v57  ;;  %v622_v59 = vmul.f32 1.442695, %v618_v58 }
 0x238   :  { %1775 = vpow2.f32 %v622_v59 }
 0x23f   :  { %v667_v49 = vpop.xlane.xlu0 %666 }
 0x240   :  { %v675_v50 = vsub.f32 %v602_v38, %v667_v49  ;;  %v1332_v38 = vmul.f32 %v1602_v33, %v2171_v23 }
 0x241   :  { %v664_v0 = vpop.xlane.xlu1 %663 }
 0x242   :  { %v680_v7 = vmul.f32 1.442695, %v675_v50  ;;  %v674_v10 = vsub.f32 %v601_v44, %v664_v0  ;;  %vm1336_vm13 = vcmp.eq.f32.partialorder %v1332_v38, 0.0 }
 0x243   :  { %v2208_v11 = vpop.eup %1773  ;;  %v673_v1 = vpop.xlane.xlu0 %672  ;;  %v1340_v43 = vsel %vm1336_vm13, -1e+20, %v1332_v38 }
 0x244   :  { %1777 = vpow2.f32 %v680_v7  ;;  %v678_v13 = vmul.f32 1.442695, %v674_v10  ;;  %v677_v14 = vsub.f32 %v604_v41, %v673_v1  ;;  %v633_v15 = vsel %vm605_vm10, %v2208_v11, 0.0 }
 0x245   :  { %v2214_v18 = vpop.eup %1775  ;;  %v670_v63 = vpop.xlane.xlu1 %669  ;;  %634 = vadd.xlane.f32.xlu0 %v633_v15  ;;  %v1333_v41 = vmul.f32 %v1601_v22, %v2181_v48  ;;  %v1346_v57 = vsel %vm605_vm10, %v1340_v43, -inf }
 0x246   :  { %1779 = vpow2.f32 %v678_v13  ;;  %v684_v20 = vmul.f32 1.442695, %v677_v14  ;;  %v676_v2 = vsub.f32 %v603_v46, %v670_v63  ;;  %v630_v5 = vsel %vm605_vm10, %v2214_v18, 0.0 }
 0x247   :  { %v2218_v21 = vpop.xlane.xlu0 %613  ;;  %631 = vadd.xlane.f32.xlu1 %v630_v5  ;;  %v1334_v46 = vmul.f32 %v1602_v33, %v2184_v51  ;;  %vm1337_vm14 = vcmp.eq.f32.partialorder %v1333_v41, 0.0 }
 0x248   :  { %1781 = vpow2.f32 %v684_v20  ;;  %v682_v6 = vmul.f32 1.442695, %v676_v2  ;;  %v620_v24 = vsub.f32 %v2181_v48, %v2218_v21  ;;  %v1341_v55 = vsel %vm1337_vm14, -1e+20, %v1333_v41 }
 0x249   :  { %v2222_v26 = vpop.xlane.xlu1 %616  ;;  %vm1338_vm15 = vcmp.eq.f32.partialorder %v1334_v46, 0.0  ;;  %v1349_v59 = vsel %vm605_vm10, %v1341_v55, -inf }
 0x24a   :  { %1783 = vpow2.f32 %v682_v6  ;;  %v626_v8 = vmul.f32 1.442695, %v620_v24  ;;  %v621_v9 = vsub.f32 %v2184_v51, %v2222_v26  ;;  %v1342_v58 = vsel %vm1338_vm15, -1e+20, %v1334_v46 }
 0x24b   :  { %v1352_v60 = vsel %vm605_vm10, %v1342_v58, -inf }
 0x24c   :  { %1785 = vpow2.f32 %v626_v8  ;;  %v628_v16 = vmul.f32 1.442695, %v621_v9 }
 0x24e   :  { %1787 = vpow2.f32 %v628_v16 }
 0x251   :  { %v2226_v30 = vpop.eup %1777 }
 0x252   :  { %v689_v28 = vsel %vm605_vm10, %v2226_v30, 0.0 }
 0x253   :  { %v2231_v29 = vpop.eup %1779  ;;  %690 = vadd.xlane.f32.xlu0 %v689_v28 }
 0x254   :  { %v686_v34 = vsel %vm605_vm10, %v2231_v29, 0.0 }
 0x255   :  { %v2237_v36 = vpop.eup %1781  ;;  %687 = vadd.xlane.f32.xlu1 %v686_v34 }
 0x256   :  { %v695_v37 = vsel %vm605_vm10, %v2237_v36, 0.0 }
 0x257   :  { %v2242_v39 = vpop.eup %1783  ;;  %696 = vadd.xlane.f32.xlu0 %v695_v37 }
 0x258   :  { %v692_v40 = vsel %vm605_vm10, %v2242_v39, 0.0 }
 0x259   :  { %v2247_v44 = vpop.eup %1785  ;;  %693 = vadd.xlane.f32.xlu1 %v692_v40 }
 0x25a   :  { %v636_v45 = vsel %vm605_vm10, %v2247_v44, 0.0 }
 0x25b   :  { %v2252_v47 = vpop.eup %1787  ;;  %637 = vadd.xlane.f32.xlu0 %v636_v45 }
 0x25c   :  { %v639_v52 = vsel %vm605_vm10, %v2252_v47, 0.0 }
 0x25d   :  { %640 = vadd.xlane.f32.xlu1 %v639_v52  ;;  %v1957_v52 = vmov 0  }
 0x25e   :  { %1724 = vset.pattern.permute.xlu1 %v1957_v52  ;;  %1723 = vset.pattern.permute.xlu0 %v1957_v52 }
 0x25f   :  { %1344 = vmax.xlane.f32.xlu0 %v1343_v53 }
 0x261   :  { %1347 = vmax.xlane.f32.xlu1 %v1346_v57 }
 0x263   :  { %1350 = vmax.xlane.f32.xlu0 %v1349_v59  ;;  %v2299_v59 = vsub.s32 0, %v2199_v61 }
 0x265   :  { %1353 = vmax.xlane.f32.xlu1 %v1352_v60 }
 0x2ce   :  { %v2263_v50 = vpop.xlane.xlu0 %634 }
 0x2d0   :  { %v2260_v49 = vpop.xlane.xlu1 %631 }
 0x2d1   :  { %1789 = vrcp.f32 %v2260_v49 }
 0x2dc   :  { %v691_v0 = vpop.xlane.xlu0 %690 }
 0x2dd   :  { %1791 = vrcp.f32 %v691_v0  ;;  %v1388_v0 = vld [vmem:[%s2567_s4 + $0x1] sm:$0x1] }
 0x2de   :  { %v1790_v4 = vpop.eup %1789  ;;  %1793 = vrcp.f32 %v2263_v50  ;;  %v688_v7 = vpop.xlane.xlu1 %687 }
 0x2df   :  { %1795 = vrcp.f32 %v688_v7  ;;  %v643_v10 = vmul.f32 %v1790_v4, %v2214_v18  ;;  %v1390_v7 = vmul.f32 16000.0, %v1388_v0 }
 0x2e0   :  { %v697_v1 = vpop.xlane.xlu0 %696 }
 0x2e1   :  { %1797 = vrcp.f32 %v697_v1  ;;  %1676 = vmatprep.mubr.msk.f32.mxu0 %vm605_vm10, %v643_v10 }
 0x2e2   :  { %v694_v12 = vpop.xlane.xlu1 %693 }
 0x2e3   :  { %1799 = vrcp.f32 %v694_v12 }
 0x2e4   :  { %v2268_v13 = vpop.xlane.xlu0 %637 }
 0x2e5   :  { %1801 = vrcp.f32 %v2268_v13 }
 0x2e6   :  { %v2271_v14 = vpop.xlane.xlu1 %640 }
 0x2e7   :  { %1803 = vrcp.f32 %v2271_v14 }
 0x2e8   :  { %v1345_v15 = vpop.xlane.xlu0 %1344 }
 0x2e9   :  { %v1355_v63 = vsub.f32 %v1339_v42, %v1345_v15 }
 0x2ea   :  { %v1792_v19 = vpop.eup %1791  ;;  %v1348_v20 = vpop.xlane.xlu1 %1347 }
 0x2eb   :  { %v1794_v2 = vpop.eup %1793  ;;  %v1359_v18 = vmul.f32 1.442695, %v1355_v63  ;;  %v1356_v5 = vsub.f32 %v1340_v43, %v1348_v20  ;;  %v701_v6 = vmul.f32 %v1792_v19, %v2226_v30  ;;  %v1400_v19 = vrot.slane %v1390_v7, %v2299_v59 }
 0x2ec   :  { %v1796_v24 = vpop.eup %1795  ;;  %v1351_v25 = vpop.xlane.xlu0 %1350  ;;  %v645_v22 = vmul.f32 %v1794_v2, %v2208_v11 }
 0x2ed   :  { %1805 = vpow2.f32 %v1359_v18  ;;  %v1361_v8 = vmul.f32 1.442695, %v1356_v5  ;;  %v1357_v9 = vsub.f32 %v1341_v55, %v1351_v25  ;;  %1672 = vmatprep.subr.mxu0 %v701_v6  ;;  %v699_v27 = vmul.f32 %v1796_v24, %v2231_v29 }
 0x2ee   :  { %v1798_v16 = vpop.eup %1797  ;;  %v1354_v17 = vpop.xlane.xlu1 %1353  ;;  %1673 = vmatpush3.msra.mxu0 %v701_v6 }
 0x2ef   :  { %1807 = vpow2.f32 %v1361_v8  ;;  %v1363_v28 = vmul.f32 1.442695, %v1357_v9  ;;  %v1358_v33 = vsub.f32 %v1342_v58, %v1354_v17  ;;  %1674 = vmatprep.subr.mxu0 %v699_v27  ;;  %v705_v34 = vmul.f32 %v1798_v16, %v2237_v36  ;;  %v1387_v58 = vld [vmem:[%s2567_s4] sm:$0x1] }
 0x2f0   :  { %v1800_v30 = vpop.eup %1799  ;;  %1675 = vmatpush3.msra.mxu0 %v699_v27  ;;  %v1389_v60 = vmul.f32 16000.0, %v1387_v58  ;;  %v1423_v17 = vadd.s32 1, %v2201_v62 }
 0x2f1   :  { %1809 = vpow2.f32 %v1363_v28  ;;  %v1365_v35 = vmul.f32 1.442695, %v1358_v33  ;;  %1677 = vmatmul.mubr.msk.f32.vlgmr.msra.gmra.mxu0 %vm605_vm10, %v645_v22  ;;  %1679 = vmatprep.subr.mxu1 %v705_v34  ;;  %v703_v29 = vmul.f32 %v1800_v30, %v2242_v39  ;;  %v1604_v28 = vsel %vm2313_vm1, 1.0, %v1956_v31 }
 0x2f2   :  { %v1802_v37 = vpop.eup %1801  ;;  %1686 = vmatprep.subr.mxu0 %v645_v22  ;;  %1680 = vmatpush3.msra.mxu1 %v705_v34  ;;  %v1396_v4 = vrot.slane %v1389_v60, %v2299_v59  ;;  %vm1425_vm2 = vcmp.eq.s32.totalorder %v2204_v3, %v1423_v17  ;;  %vm1424_vm4 = vcmp.eq.s32.totalorder %v2199_v61, %v1423_v17  ;;  %v1959_v17 = vmov 1966171168  }
 0x2f3   :  { %1811 = vpow2.f32 %v1365_v35  ;;  %1687 = vmatpush3.msra.mxu0 %v645_v22  ;;  %1690 = vmatprep.mubr.msk.f32.mxu0 %vm605_vm10, %v699_v27  ;;  %v647_v11 = vmul.f32 %v1802_v37, %v2247_v44  ;;  %v1606_v33 = vsel %vm1425_vm2, 1.0, %v1956_v31  ;;  %v1603_v35 = vsel %vm2324_vm3, 1.0, %v1956_v31 }
 0x2f4   :  { %v1804_v38 = vpop.eup %1803  ;;  %1681 = vmatprep.subr.mxu1 %v703_v29  ;;  %1688 = vmatprep.subr.mxu0 %v643_v10 }
 0x2f5   :  { %1682 = vmatpush3.msra.mxu1 %v703_v29  ;;  %1689 = vmatpush3.msra.mxu0 %v643_v10  ;;  %v649_v36 = vmul.f32 %v1804_v38, %v2252_v47 }
 0x2f6   :  { %1683 = vmatprep.mubr.msk.f32.mxu1 %vm605_vm10, %v647_v11  ;;  %1691 = vmatmul.mubr.msk.f32.vlgmr.msra.gmra.mxu0 %vm605_vm10, %v701_v6 }
 0x2f7   :  { %1684 = vmatmul.mubr.msk.f32.vlgmr.msra.gmra.mxu1 %vm605_vm10, %v649_v36  ;;  %1693 = vmatprep.subr.mxu1 %v649_v36 }
 0x2f8   :  { %1694 = vmatpush3.msra.mxu1 %v649_v36  ;;  %1697 = vmatprep.mubr.msk.f32.mxu1 %vm605_vm10, %v703_v29  ;;  %v1605_v29 = vsel %vm1424_vm4, 1.0, %v1956_v31 }
 0x2f9   :  { %1695 = vmatprep.subr.mxu1 %v647_v11  ;;  %1700 = vmatprep.subr.mxu0 %v1956_v31  ;;  %v1430_v37 = vsub.f32 %v1603_v35, %v1605_v29  ;;  %v1598_v29 = vld.sshfl [vmem:[%s2566_s3] sm:$0x11 pattern:$0x75316420] }
 0x2fa   :  { %v1806_v39 = vpop.eup %1805  ;;  %1696 = vmatpush3.msra.mxu1 %v647_v11  ;;  %1704 = vmatprep.mubr.msk.f32.mxu0 %vm1958_vm5, %v1956_v31 }
 0x2fb   :  { %1698 = vmatmul.mubr.msk.f32.vlgmr.msra.gmra.mxu1 %vm605_vm10, %v705_v34  ;;  %v1367_v40 = vsel %vm605_vm10, %v1806_v39, 0.0  ;;  %v1431_v34 = vsub.f32 %v1604_v28, %v1606_v33  ;;  %v1226_v28 = vunpack.c.l.s4 %v1959_v17 }
 0x2fc   :  { %v1808_v41 = vpop.eup %1807  ;;  %1368 = vadd.xlane.f32.xlu0 %v1367_v40 }
 0x2fd   :  { %v1370_v44 = vsel %vm605_vm10, %v1808_v41, 0.0  ;;  %1701 = vmatpush3.msra.mxu0 %v1431_v34  ;;  %v1227_v35 = vunpack.c.0.s8 %v1226_v28 }
 0x2fe   :  { %v1810_v45 = vpop.eup %1809  ;;  %1371 = vadd.xlane.f32.xlu1 %v1370_v44  ;;  %1702 = vmatprep.subr.mxu0 %v1956_v31 }
 0x2ff   :  { %v1373_v46 = vsel %vm605_vm10, %v1810_v45, 0.0  ;;  %1703 = vmatpush3.msra.mxu0 %v1430_v37  ;;  %v1224_v37 = vcombine.high %v1598_v29, %v1598_v29 }
 0x300   :  { %v1812_v47 = vpop.eup %1811  ;;  %1374 = vadd.xlane.f32.xlu0 %v1373_v46 }
 0x301   :  { %v1376_v42 = vsel %vm605_vm10, %v1812_v47, 0.0 }
 0x302   :  { %1377 = vadd.xlane.f32.xlu1 %v1376_v42 }
 0x385   :  { %v1369_v43 = vpop.xlane.xlu0 %1368 }
 0x386   :  { %1813 = vrcp.f32 %v1369_v43 }
 0x387   :  { %v1372_v53 = vpop.xlane.xlu1 %1371 }
 0x388   :  { %1815 = vrcp.f32 %v1372_v53 }
 0x389   :  { %v1375_v55 = vpop.xlane.xlu0 %1374 }
 0x38a   :  { %1817 = vrcp.f32 %v1375_v55 }
 0x38b   :  { %v1378_v57 = vpop.xlane.xlu1 %1377 }
 0x38c   :  { %1819 = vrcp.f32 %v1378_v57 }
 0x393   :  { %v1814_v10 = vpop.eup %1813 }
 0x394   :  { %v1380_v1 = vmul.f32 %v1814_v10, %v1806_v39 }
 0x395   :  { %v1816_v12 = vpop.eup %1815 }
 0x396   :  { %v1403_v15 = vmul.f32 %v1396_v4, %v1380_v1  ;;  %v1382_v63 = vmul.f32 %v1816_v12, %v1808_v41 }
 0x397   :  { %v1818_v20 = vpop.eup %1817 }
 0x398   :  { %v1407_v2 = vsel %vm605_vm10, %v1403_v15, 0.0  ;;  %v1404_v18 = vmul.f32 %v1396_v4, %v1382_v63  ;;  %v1384_v5 = vmul.f32 %v1818_v20, %v1810_v45 }
 0x399   :  { %v1820_v6 = vpop.eup %1819  ;;  %1408 = vadd.xlane.f32.xlu0 %v1407_v2 }
 0x39a   :  { %v1410_v24 = vsel %vm605_vm10, %v1404_v18, 0.0  ;;  %v1405_v25 = vmul.f32 %v1400_v19, %v1384_v5  ;;  %v1386_v8 = vmul.f32 %v1820_v6, %v1812_v47 }
 0x39b   :  { %1411 = vadd.xlane.f32.xlu1 %v1410_v24 }
 0x39c   :  { %v1413_v9 = vsel %vm605_vm10, %v1405_v25, 0.0  ;;  %v1406_v27 = vmul.f32 %v1400_v19, %v1386_v8 }
 0x39d   :  { %1414 = vadd.xlane.f32.xlu0 %v1413_v9 }
 0x39e   :  { %v1416_v16 = vsel %vm605_vm10, %v1406_v27, 0.0 }
 0x39f   :  { %1417 = vadd.xlane.f32.xlu1 %v1416_v16 }
 0x3b1   :  { %v1678_v11 = vpop.f32.mrf.mxu0 }
 0x3b2   :  { %v789_v38 = vadd.f32 1e-20, %v1678_v11  ;;  %v1230_v11 = vsub.s32 %v1227_v35, %v2199_v61 }
 0x3b3   :  { %v783_v36 = vpop.f32.mrf.mxu0 }
 0x3b4   :  { %1821 = vlog2.f32 %v789_v38  ;;  %v784_v39 = vadd.f32 1e-20, %v783_v36  ;;  %v1238_v38 = vrot.slane %v1224_v37, %v1230_v11 }
 0x3b6   :  { %1823 = vlog2.f32 %v784_v39  ;;  %v1692_v40 = vpop.f32.mrf.mxu0  ;;  %v1246_v36 = vrot.slane %v1238_v38, %v2299_v59  ;;  %v1231_v39 = vrot.slane %v1598_v29, %v1230_v11 }
 0x3b7   :  { %v1027_v41 = vadd.f32 1e-20, %v1692_v40  ;;  %v1685_v44 = vpop.f32.mrf.mxu1 }
 0x3b8   :  { %v1021_v45 = vpop.f32.mrf.mxu0  ;;  %v870_v42 = vadd.f32 1e-20, %v1685_v44  ;;  %v1242_v40 = vrot.slane %v1231_v39, %v2299_v59 }
 0x3b9   :  { %1825 = vlog2.f32 %v1027_v41  ;;  %v1022_v46 = vadd.f32 1e-20, %v1021_v45  ;;  %v864_v47 = vpop.f32.mrf.mxu1  ;;  %v1440_v41 = vadd.s32 4294967288, %v2201_v62 }
 0x3ba   :  { %v865_v43 = vadd.f32 1e-20, %v864_v47  ;;  %v1438_v47 = vsub.s32 %v2201_v62, %v2199_v61 }
 0x3bb   :  { %1827 = vlog2.f32 %v1022_v46  ;;  %v1699_v53 = vpop.f32.mrf.mxu1  ;;  %v1443_v45 = vsub.s32 %v1440_v41, %v2199_v61 }
 0x3bc   :  { %1829 = vlog2.f32 %v865_v43  ;;  %v1108_v31 = vadd.f32 1e-20, %v1699_v53 }
 0x3bd   :  { %v1102_v55 = vpop.f32.mrf.mxu1  ;;  %1831 = vlog2.f32 %v870_v42 }
 0x3be   :  { %v1103_v57 = vadd.f32 1e-20, %v1102_v55  ;;  %1833 = vlog2.f32 %v1108_v31 }
 0x3c0   :  { %1835 = vlog2.f32 %v1103_v57 }
 0x3c1   :  { %v1822_v58 = vpop.eup %1821 }
 0x3c2   :  { %v2335_v60 = vmul.f32 0.6931472, %v1822_v58 }
 0x3c3   :  { %v1824_v0 = vpop.eup %1823 }
 0x3c4   :  { %v2337_v4 = vmul.f32 0.6931472, %v1824_v0  ;;  %v900_v7 = vsel %vm605_vm10, %v2335_v60, -inf }
 0x3c5   :  { %901 = vmax.xlane.f32.xlu1 %v900_v7 }
 0x3c6   :  { %v1826_v10 = vpop.eup %1825  ;;  %v897_v1 = vsel %vm605_vm10, %v2337_v4, -inf  ;;  %v881_v11 = vsel %vm2324_vm3, %v2337_v4, 0.0 }
 0x3c7   :  { %v2343_v12 = vmul.f32 0.6931472, %v1826_v10  ;;  %898 = vmax.xlane.f32.xlu0 %v897_v1  ;;  %v885_v39 = vsel %vm605_vm10, %v881_v11, 0.0 }
 0x3c8   :  { %v1828_v15 = vpop.eup %1827 }
 0x3c9   :  { %v1830_v63 = vpop.eup %1829  ;;  %v1138_v19 = vsel %vm605_vm10, %v2343_v12, -inf  ;;  %v2349_v5 = vmul.f32 0.6931472, %v1828_v15 }
 0x3ca   :  { %v2347_v20 = vmul.f32 0.6931472, %v1830_v63  ;;  %1139 = vmax.xlane.f32.xlu1 %v1138_v19  ;;  %v1832_v2 = vpop.eup %1831 }
 0x3cb   :  { %v1834_v18 = vpop.eup %1833  ;;  %v2355_v8 = vmul.f32 0.6931472, %v1832_v2  ;;  %v1135_v16 = vsel %vm605_vm10, %v2349_v5, -inf }
 0x3cc   :  { %v903_v6 = vsel %vm605_vm10, %v2347_v20, -inf  ;;  %v2357_v9 = vmul.f32 0.6931472, %v1834_v18 }
 0x3cd   :  { %v1836_v24 = vpop.eup %1835  ;;  %904 = vmax.xlane.f32.xlu0 %v903_v6  ;;  %v906_v34 = vsel %vm605_vm10, %v2355_v8, -inf }
 0x3ce   :  { %v2353_v25 = vmul.f32 0.6931472, %v1836_v24  ;;  %v1144_v33 = vsel %vm605_vm10, %v2357_v9, -inf }
 0x3d0   :  { %v1141_v27 = vsel %vm605_vm10, %v2353_v25, -inf }
 0x3d1   :  { %1142 = vmax.xlane.f32.xlu1 %v1141_v27  ;;  %1136 = vmax.xlane.f32.xlu0 %v1135_v16 }
 0x3d5   :  { %1145 = vmax.xlane.f32.xlu1 %v1144_v33  ;;  %907 = vmax.xlane.f32.xlu0 %v906_v34 }
 0x3e6   :  { %1251 = vperm.xlu1 %1724, %v1246_v36  }
 0x3eb   :  { %1248 = vperm.xlu0 %1723, %v1242_v40  }
 0x422   :  { %v1409_v44 = vpop.xlane.xlu0 %1408 }
 0x423   :  { %v1439_v31 = vrot.slane %v1409_v44, %v1438_v47  ;;  %v1119_v44 = vsel %vm2324_vm3, %v2349_v5, 0.0 }
 0x424   :  { %v1412_v46 = vpop.xlane.xlu1 %1411 }
 0x425   :  { %v1444_v43 = vrot.slane %v1412_v46, %v1443_v45  ;;  %v1123_v46 = vsel %vm605_vm10, %v1119_v44, 0.0 }
 0x426   :  { %v1415_v42 = vpop.xlane.xlu0 %1414 }
 0x427   :  { %v1450_v55 = vrot.slane %v1415_v42, %v1438_v47  ;;  %v1446_v58 = vsel %vm1445_vm6, %v1444_v43, %v1439_v31  ;;  %v883_v47 = vsel %vm2324_vm3, %v2347_v20, 0.0 }
 0x428   :  { %v1418_v53 = vpop.xlane.xlu1 %1417 }
 0x429   :  { %v1454_v57 = vrot.slane %v1418_v53, %v1443_v45 }
 0x42b   :  { %v1455_v0 = vsel %vm1445_vm6, %v1454_v57, %v1450_v55  ;;  %v891_v55 = vsel %vm605_vm10, %v883_v47, 0.0 }
 0x42c   :  { %v1457_v7 = vsel %vm1456_vm7, %v1455_v0, %v1446_v58  ;;  %vm1199_vm7 = vcmask 7168  }
 0x42d   :  { %1705 = vmatmul.mubr.msk.f32.vlgmr.msra.gmra.mxu0 %vm605_vm10, %v1457_v7 }
 0x44e   :  { %v2378_v10 = vpop.xlane.xlu1 %901 }
 0x44f   :  { %v910_v1 = vsub.f32 %v2335_v60, %v2378_v10 }
 0x450   :  { %v2382_v63 = vpop.xlane.xlu0 %898 }
 0x451   :  { %v915_v15 = vmul.f32 1.442695, %v910_v1  ;;  %v909_v24 = vsub.f32 %v2337_v4, %v2382_v63 }
 0x453   :  { %1837 = vpow2.f32 %v915_v15  ;;  %v2384_v19 = vpop.xlane.xlu1 %1139  ;;  %v913_v35 = vmul.f32 1.442695, %v909_v24  ;;  %v884_v15 = vsel %vm2313_vm1, %v2355_v8, 0.0 }
 0x454   :  { %v1148_v36 = vsub.f32 %v2343_v12, %v2384_v19 }
 0x456   :  { %v2386_v2 = vpop.xlane.xlu0 %904  ;;  %v1153_v45 = vmul.f32 1.442695, %v1148_v36 }
 0x457   :  { %v911_v29 = vsub.f32 %v2347_v20, %v2386_v2 }
 0x459   :  { %v917_v40 = vmul.f32 1.442695, %v911_v29 }
 0x45a   :  { %v2388_v18 = vpop.xlane.xlu1 %1142  ;;  %v2390_v6 = vpop.xlane.xlu0 %1136 }
 0x45b   :  { %v1147_v57 = vsub.f32 %v2349_v5, %v2390_v6  ;;  %v1149_v24 = vsub.f32 %v2353_v25, %v2388_v18 }
 0x45e   :  { %v2394_v27 = vpop.xlane.xlu1 %1145  ;;  %v2396_v16 = vpop.xlane.xlu0 %907 }
 0x45f   :  { %v912_v17 = vsub.f32 %v2355_v8, %v2396_v16  ;;  %v1150_v42 = vsub.f32 %v2357_v9, %v2394_v27 }
 0x460   :  { %v1838_v28 = vpop.eup %1837 }
 0x461   :  { %v919_v33 = vmul.f32 1.442695, %v912_v17  ;;  %v924_v34 = vsel %vm605_vm10, %v1838_v28, 0.0  ;;  %v1157_v58 = vmul.f32 1.442695, %v1150_v42  ;;  %v882_v42 = vsel %vm2313_vm1, %v2335_v60, 0.0 }
 0x462   :  { %v2403_v37 = vpop.permute.xlu1 %1251  ;;  %925 = vadd.xlane.f32.xlu0 %v924_v34  ;;  %v1151_v17 = vmul.f32 1.442695, %v1147_v57  ;;  %v1121_v60 = vsel %vm2324_vm3, %v2353_v25, 0.0 }
 0x463   :  { %v1255_v38 = vsub.s32 %v2199_v61, %v2403_v37  ;;  %1839 = vpow2.f32 %v919_v33  ;;  %v1155_v33 = vmul.f32 1.442695, %v1149_v24 }
 0x464   :  { %1841 = vpow2.f32 %v913_v35 }
 0x465   :  { %vm1261_vm8 = vcmp.gt.s32.totalorder %v1255_v38, 0  ;;  %1843 = vpow2.f32 %v917_v40 }
 0x466   :  { %886 = vadd.xlane.f32.xlu0 %v885_v39  ;;  %v1249_v41 = vpop.permute.xlu0 %1248  ;;  %v1262_v43 = vsel %vm1261_vm8, %v1255_v38, 0  ;;  %1845 = vpow2.f32 %v1153_v45  ;;  %vm1536_vm8 = vcmp.ge.s32.totalorder %v2201_v62, 2 }
 0x467   :  { %v1253_v4 = vsub.s32 %v2199_v61, %v1249_v41  ;;  %vm1269_vm12 = vcmp.lt.s32.totalorder %v1262_v43, 15  ;;  %1847 = vpow2.f32 %v1157_v58 }
 0x468   :  { %v1270_v0 = vsel %vm1269_vm12, %v1262_v43, 15  ;;  %1849 = vpow2.f32 %v1151_v17  ;;  %v1256_v43 = vsub.s32 %v2204_v3, %v2403_v37 }
 0x469   :  { %vm1257_vm9 = vcmp.gt.s32.totalorder %v1253_v4, 0  ;;  %vm1275_vm13 = vcmp.eq.s32.totalorder %v2201_v62, %v1270_v0  ;;  %1851 = vpow2.f32 %v1155_v33 }
 0x46a   :  { %v1258_v53 = vsel %vm1257_vm9, %v1253_v4, 0  ;;  %1124 = vadd.xlane.f32.xlu0 %v1123_v46  ;;  %v1279_v8 = vsel %vm1275_vm13, %v2181_v48, 0.0  ;;  %v1254_v48 = vsub.s32 %v2204_v3, %v1249_v41  ;;  %v1120_v41 = vsel %vm2313_vm1, %v2343_v12, 0.0 }
 0x46b   :  { %vm1265_vm0 = vcmp.lt.s32.totalorder %v1258_v53, 15  ;;  %v1287_v29 = vsel %vm605_vm10, %v1279_v8, 0.0  ;;  %vm1263_vm2 = vcmp.gt.s32.totalorder %v1256_v43, 0  ;;  %v1129_v3 = vsel %vm605_vm10, %v1121_v60, 0.0 }
 0x46c   :  { %v1266_v31 = vsel %vm1265_vm0, %v1258_v53, 15  ;;  %vm1259_vm14 = vcmp.gt.s32.totalorder %v1254_v48, 0  ;;  %v888_v53 = vsel %vm605_vm10, %v882_v42, 0.0  ;;  %v1264_v57 = vsel %vm1263_vm2, %v1256_v43, 0 }
 0x46d   :  { %vm1273_vm11 = vcmp.eq.s32.totalorder %v2201_v62, %v1266_v31  ;;  %v1260_v47 = vsel %vm1259_vm14, %v1254_v48, 0  ;;  %vm1271_vm5 = vcmp.lt.s32.totalorder %v1264_v57, 15  ;;  %1853 = vlog2.f32 %v2260_v49 }
 0x46e   :  { %892 = vadd.xlane.f32.xlu0 %v891_v55  ;;  %v1277_v20 = vsel %vm1273_vm11, %v2173_v32, 0.0  ;;  %v894_v32 = vsel %vm605_vm10, %v884_v15, 0.0  ;;  %vm1267_vm15 = vcmp.lt.s32.totalorder %v1260_v47, 15  ;;  %v1126_v55 = vsel %vm605_vm10, %v1120_v41, 0.0 }
 0x46f   :  { %v1281_v1 = vsel %vm605_vm10, %v1277_v20, 0.0  ;;  %v1268_v31 = vsel %vm1267_vm15, %v1260_v47, 15  ;;  %v1272_v58 = vsel %vm1271_vm5, %v1264_v57, 15  ;;  %v1122_v20 = vsel %vm2313_vm1, %v2357_v9, 0.0 }
 0x470   :  { %v1840_v7 = vpop.eup %1839  ;;  %vm1274_vm4 = vcmp.eq.s32.totalorder %v2201_v62, %v1268_v31  ;;  %vm1276_vm6 = vcmp.eq.s32.totalorder %v2201_v62, %v1272_v58  ;;  %v1132_v30 = vsel %vm605_vm10, %v1122_v20, 0.0  ;;  %1855 = vlog2.f32 %v2268_v13 }
 0x471   :  { %v930_v28 = vsel %vm605_vm10, %v1840_v7, 0.0  ;;  %v1842_v5 = vpop.eup %1841  ;;  %v1278_v37 = vsel %vm1274_vm4, %v2171_v23, 0.0  ;;  %v1280_v25 = vsel %vm1276_vm6, %v2184_v51, 0.0  ;;  %vm67_vm1 = vcmp.lt.s32.totalorder %v2199_v61, 2 }
 0x472   :  { %1282 = vadd.xlane.f32.xlu0 %v1281_v1  ;;  %931 = vadd.xlane.f32.xlu1 %v930_v28  ;;  %v921_v34 = vsel %vm605_vm10, %v1842_v5, 0.0  ;;  %v1844_v35 = vpop.eup %1843  ;;  %v1284_v12 = vsel %vm605_vm10, %v1278_v37, 0.0  ;;  %v1290_v0 = vsel %vm605_vm10, %v1280_v25, 0.0  ;;  %v68_v51 = vsel %vm67_vm1, 1, %v1957_v52 }
 0x473   :  { %v927_v11 = vsel %vm605_vm10, %v1844_v35, 0.0  ;;  %v1846_v38 = vpop.eup %1845  ;;  %v72_v49 = vrot.slane %v68_v51, %v2299_v59  ;;  %v75_v5 = vsub.s32 1, %v2199_v61  ;;  %vm1537_vm9 = vcmp.le.s32.totalorder %v2201_v62, 12 }
 0x474   :  { %v1162_v36 = vsel %vm605_vm10, %v1846_v38, 0.0  ;;  %v1848_v39 = vpop.eup %1847  ;;  %vm1538_vm11 = vmand %vm1536_vm8, %vm1537_vm9  ;;  %vm1542_vm13 = vcmask 123904  }
 0x475   :  { %v1168_v40 = vsel %vm605_vm10, %v1848_v39, 0.0  ;;  %v1850_v44 = vpop.eup %1849  ;;  %v2495_v59 = vrot.slane %v68_v51, %v75_v5  ;;  %vm1540_vm12 = vmand %vm1538_vm11, %vm67_vm1 }
 0x476   :  { %895 = vadd.xlane.f32.xlu0 %v894_v32  ;;  %922 = vadd.xlane.f32.xlu1 %v921_v34  ;;  %v1159_v4 = vsel %vm605_vm10, %v1850_v44, 0.0  ;;  %v1852_v45 = vpop.eup %1851 }
 0x477   :  { %v1165_v46 = vsel %vm605_vm10, %v1852_v45, 0.0  ;;  %vm2487_vm10 = vcmp.ne.s32.totalorder %v72_v49, 0  ;;  %vm78_vm3 = vcmp.ne.s32.totalorder %v2495_v59, 0 }
 0x47a   :  { %1288 = vadd.xlane.f32.xlu0 %v1287_v29  ;;  %928 = vadd.xlane.f32.xlu1 %v927_v11  ;;  %v1854_v9 = vpop.eup %1853 }
 0x47b   :  { %v651_v24 = vmul.f32 0.6931472, %v1854_v9 }
 0x47d   :  { %v658_v28 = vadd.f32 %v651_v24, %v2195_v56  ;;  %v1856_v13 = vpop.eup %1855 }
 0x47e   :  { %1163 = vadd.xlane.f32.xlu1 %v1162_v36  ;;  %v655_v35 = vmul.f32 0.6931472, %v1856_v13 }
 0x480   :  { %v660_v11 = vadd.f32 %v655_v35, %v2218_v21 }
 0x482   :  { %1169 = vadd.xlane.f32.xlu1 %v1168_v40 }
 0x486   :  { %1160 = vadd.xlane.f32.xlu1 %v1159_v4 }
 0x48a   :  { %1166 = vadd.xlane.f32.xlu1 %v1165_v46 }
 0x48e   :  { %889 = vadd.xlane.f32.xlu1 %v888_v53 }
 0x492   :  { %1127 = vadd.xlane.f32.xlu1 %v1126_v55 }
 0x496   :  { %1130 = vadd.xlane.f32.xlu1 %v1129_v3 }
 0x49a   :  { %1285 = vadd.xlane.f32.xlu1 %v1284_v12 }
 0x49e   :  { %1133 = vadd.xlane.f32.xlu1 %v1132_v30 }
 0x4a2   :  { %1291 = vadd.xlane.f32.xlu1 %v1290_v0 }
 0x4eb   :  { %v926_v23 = vpop.xlane.xlu0 %925 }
 0x4ed   :  { %v2471_v7 = vpop.f32.mrf.mxu0 }
 0x4ef   :  { %v1706_v1 = vpop.f32.mrf.mxu0  ;;  %v2474_v22 = vpop.xlane.xlu0 %886 }
 0x4f3   :  { %v2477_v15 = vpop.xlane.xlu0 %1124 }
 0x4f7   :  { %v2483_v17 = vpop.xlane.xlu0 %892 }
 0x4fb   :  { %v1283_v33 = vpop.xlane.xlu0 %1282  ;;  %v932_v34 = vpop.xlane.xlu1 %931 }
 0x4fc   :  { %v1293_v8 = vsub.f32 %v658_v28, %v1283_v33 }
 0x4fe   :  { %v2493_v52 = vsel %vm2487_vm10, %v1293_v8, 0.0 }
 0x4ff   :  { %v2497_v29 = vpop.xlane.xlu0 %895  ;;  %v923_v56 = vpop.xlane.xlu1 %922 }
 0x503   :  { %v1289_v38 = vpop.xlane.xlu0 %1288  ;;  %v929_v36 = vpop.xlane.xlu1 %928 }
 0x504   :  { %v1295_v39 = vsub.f32 %v660_v11, %v1289_v38 }
 0x506   :  { %v2503_v40 = vsel %vm78_vm3, %v1295_v39, 0.0  ;;  %v1301_v39 = vsel %vm1199_vm7, %v2493_v52, 0.0 }
 0x507   :  { %v1164_v44 = vpop.xlane.xlu1 %1163  ;;  %v1304_v32 = vsel %vm1199_vm7, %v2503_v40, 0.0 }
 0x508   :  { %1857 = vlog2.f32 %v1164_v44 }
 0x509   :  { %1859 = vlog2.f32 %v926_v23 }
 0x50a   :  { %1861 = vlog2.f32 %v923_v56 }
 0x50b   :  { %v1170_v48 = vpop.xlane.xlu1 %1169  ;;  %1863 = vlog2.f32 %v2263_v50 }
 0x50c   :  { %1865 = vlog2.f32 %v929_v36 }
 0x50d   :  { %1867 = vlog2.f32 %v2271_v14 }
 0x50e   :  { %1869 = vlog2.f32 %v932_v34 }
 0x50f   :  { %v1161_v21 = vpop.xlane.xlu1 %1160 }
 0x510   :  { %1871 = vlog2.f32 %v1161_v21 }
 0x511   :  { %1873 = vlog2.f32 %v1170_v48 }
 0x513   :  { %v1167_v4 = vpop.xlane.xlu1 %1166 }
 0x514   :  { %1875 = vlog2.f32 %v1167_v4 }
 0x515   :  { %v1858_v45 = vpop.eup %1857 }
 0x516   :  { %v1860_v46 = vpop.eup %1859  ;;  %v1174_v43 = vmul.f32 0.6931472, %v1858_v45 }
 0x517   :  { %v1862_v47 = vpop.eup %1861  ;;  %v890_v42 = vpop.xlane.xlu1 %889  ;;  %v936_v31 = vmul.f32 0.6931472, %v1860_v46 }
 0x518   :  { %v1864_v53 = vpop.eup %1863  ;;  %v934_v55 = vmul.f32 0.6931472, %v1862_v47  ;;  %v1180_v14 = vadd.f32 %v1174_v43, %v2384_v19 }
 0x519   :  { %v1866_v41 = vpop.eup %1865  ;;  %v653_v58 = vmul.f32 0.6931472, %v1864_v53  ;;  %v942_v25 = vadd.f32 %v936_v31, %v2378_v10  ;;  %v1532_v10 = vmul.f32 0.5, %v2471_v7 }
 0x51a   :  { %v1868_v57 = vpop.eup %1867  ;;  %v938_v37 = vmul.f32 0.6931472, %v1866_v41  ;;  %v941_v20 = vadd.f32 %v934_v55, %v2382_v63 }
 0x51b   :  { %v1128_v50 = vpop.xlane.xlu1 %1127  ;;  %v1870_v60 = vpop.eup %1869  ;;  %v657_v1 = vmul.f32 0.6931472, %v1868_v57  ;;  %v946_v24 = vsub.f32 %v942_v25, %v890_v42  ;;  %v659_v13 = vadd.f32 %v653_v58, %v2191_v54 }
 0x51c   :  { %v1184_v0 = vsub.f32 %v1180_v14, %v1128_v50  ;;  %v940_v9 = vmul.f32 0.6931472, %v1870_v60  ;;  %v943_v28 = vadd.f32 %v938_v37, %v2386_v2  ;;  %v945_v5 = vsub.f32 %v941_v20, %v2474_v22 }
 0x51d   :  { %v1872_v3 = vpop.eup %1871  ;;  %v661_v35 = vadd.f32 %v657_v1, %v2222_v26  ;;  %v1530_v22 = vand.u32 2147483647, %v2471_v7 }
 0x51e   :  { %v1874_v12 = vpop.eup %1873  ;;  %v1172_v30 = vmul.f32 0.6931472, %v1872_v3  ;;  %v1188_v34 = vadd.f32 %v1184_v0, %v946_v24 }
 0x51f   :  { %v1131_v23 = vpop.xlane.xlu1 %1130  ;;  %v1178_v19 = vmul.f32 0.6931472, %v1874_v12  ;;  %v1608_v46 = vadd.f32 -0.5, %v1530_v22  ;;  %vm2539_vm0 = vcmp.lt.f32.partialorder %v1530_v22, 1.0 }
 0x520   :  { %v1179_v51 = vadd.f32 %v1172_v30, %v2390_v6  ;;  %v944_v6 = vadd.f32 %v940_v9, %v2396_v16  ;;  %v1196_v38 = vsel %vm2487_vm10, %v1188_v34, 0.0  ;;  %v1533_v16 = vmul.f32 %v1532_v10, %v2471_v7 }
 0x521   :  { %v1876_v49 = vpop.eup %1875  ;;  %v1182_v11 = vadd.f32 %v1178_v19, %v2394_v27  ;;  %v1201_v47 = vsel %vm1199_vm7, %v1196_v38, 0.0 }
 0x522   :  { %v1183_v63 = vsub.f32 %v1179_v51, %v2477_v15  ;;  %v1176_v33 = vmul.f32 0.6931472, %v1876_v49  ;;  %v947_v15 = vsub.f32 %v943_v28, %v2483_v17  ;;  %v948_v48 = vsub.f32 %v944_v6, %v2497_v29 }
 0x523   :  { %v1286_v8 = vpop.xlane.xlu1 %1285  ;;  %v1535_v50 = vsel %vm2539_vm0, %v1533_v16, %v1608_v46 }
 0x524   :  { %v1181_v2 = vadd.f32 %v1176_v33, %v2388_v18  ;;  %v1294_v56 = vsub.f32 %v659_v13, %v1286_v8  ;;  %v1187_v54 = vadd.f32 %v1183_v63, %v945_v5  ;;  %v1541_v37 = vsel %vm1540_vm12, %v1535_v50, 0.0 }
 0x525   :  { %v1543_v58 = vsel %vm1542_vm13, %v1541_v37, 0.0 }
 0x526   :  { %v1185_v26 = vsub.f32 %v1181_v2, %v1131_v23  ;;  %v1298_v36 = vsel %vm2487_vm10, %v1294_v56, 0.0  ;;  %v1195_v18 = vsel %vm2487_vm10, %v1187_v54, 0.0 }
 0x527   :  { %v1302_v17 = vsel %vm1199_vm7, %v1298_v36, 0.0  ;;  %v1134_v27 = vpop.xlane.xlu1 %1133  ;;  %v1200_v44 = vsel %vm1199_vm7, %v1195_v18, 0.0 }
 0x528   :  { %v1189_v21 = vadd.f32 %v1185_v26, %v947_v15  ;;  %v1303_v4 = vadd.f32 %v1302_v17, %v1301_v39  ;;  %v1186_v45 = vsub.f32 %v1182_v11, %v1134_v27  ;;  %v1202_v43 = vadd.f32 %v1201_v47, %v1200_v44 }
 0x52a   :  { %v1197_v52 = vsel %vm78_vm3, %v1189_v21, 0.0  ;;  %v1190_v42 = vadd.f32 %v1186_v45, %v948_v48  ;;  %v1305_v53 = vadd.f32 %v1304_v32, %v1303_v4 }
 0x52b   :  { %v1292_v29 = vpop.xlane.xlu1 %1291  ;;  %v1203_v40 = vsel %vm1199_vm7, %v1197_v52, 0.0 }
 0x52c   :  { %v1296_v41 = vsub.f32 %v661_v35, %v1292_v29  ;;  %v1198_v31 = vsel %vm78_vm3, %v1190_v42, 0.0  ;;  %v1204_v55 = vadd.f32 %v1203_v40, %v1202_v43 }
 0x52d   :  { %v1205_v57 = vsel %vm1199_vm7, %v1198_v31, 0.0 }
 0x52e   :  { %v1300_v62 = vsel %vm78_vm3, %v1296_v41, 0.0  ;;  %v1206_v60 = vadd.f32 %v1205_v57, %v1204_v55 }
 0x52f   :  { %v1306_v14 = vsel %vm1199_vm7, %v1300_v62, 0.0 }
 0x530   :  { %1207 = vadd.xlane.f32.xlu0 %v1206_v60  ;;  %v1307_v3 = vadd.f32 %v1306_v14, %v1305_v53 }
 0x532   :  { %1308 = vadd.xlane.f32.xlu1 %v1307_v3 }
 0x534   :  { %1544 = vadd.xlane.f32.xlu0 %v1543_v58 }
 0x5b9   :  { %v1208_v12 = vpop.xlane.xlu0 %1207 }
 0x5ba   :  { %v1209_v20 = vrot.slane %v1208_v12, 4 }
 0x5bb   :  { %v1309_v30 = vpop.xlane.xlu1 %1308 }
 0x5bc   :  { %v1210_v25 = vadd.f32 %v1209_v20, %v1208_v12  ;;  %v1310_v0 = vrot.slane %v1309_v30, 4 }
 0x5bd   :  { %v1545_v61 = vpop.xlane.xlu0 %1544 }
 0x5be   :  { %v1211_v23 = vrot.slane %v1210_v25, 2  ;;  %v1311_v1 = vadd.f32 %v1310_v0, %v1309_v30  ;;  %v1546_v59 = vrot.slane %v1545_v61, 4 }
 0x5c0   :  { %v1312_v9 = vrot.slane %v1311_v1, 2  ;;  %v1547_v51 = vadd.f32 %v1546_v59, %v1545_v61  ;;  %v1212_v24 = vadd.f32 %v1211_v23, %v1210_v25 }
 0x5c2   :  { %v1313_v49 = vadd.f32 %v1312_v9, %v1311_v1  ;;  %v1548_v28 = vrot.slane %v1547_v51, 2  ;;  %v1213_v19 = vrot.slane %v1212_v24, 1 }
 0x5c4   :  { %v1549_v13 = vadd.f32 %v1548_v28, %v1547_v51  ;;  %v1214_v5 = vadd.f32 %v1213_v19, %v1212_v24  ;;  %v1314_v63 = vrot.slane %v1313_v49, 1 }
 0x5c6   :  { %1707 = vpush %v1214_v5  ;;  %v1315_v33 = vadd.f32 %v1314_v63, %v1313_v49  ;;  %v1550_v34 = vrot.slane %v1549_v13, 1 }
 0x5c8   :  { %1709 = vpush %v1315_v33  ;;  %v1551_v10 = vadd.f32 %v1550_v34, %v1549_v13 }
 0x5ca   :  { %1711 = vpush %v1551_v10 }
 0x5f7   :  { %s1708_s3 = spop %1707 }
 0x5f8   :  { %1554 = sst [smem:[#allocation8]] %s1708_s3 }
 0x5f9   :  { %s1710_s12 = spop %1709 }
 0x5fa   :  { %1556 = sst [smem:[#allocation8 + $0x1]] %s1710_s12 }
 0x5fb   :  { %s1712_s13 = spop %1711 }
 0x5fc   :  { %1558 = sst [smem:[#allocation8 + $0x2]] %s1712_s13 }
 0x5fd   :  { %1566 = dma.smem_to_hbm %s1960_s14, 16, %s2568_s5, [#allocation4]  }
 0x5fe   :  { %1949 = dma.done.wait [#allocation4], 16  }
 0x5ff   :  { %1950 = vsyncadd [#allocation4], 4294967280 }
 0x600   :  { %1570 = sfence }
 0x601   :  { %1571 = vsyncpa [#allocation3], 1 }
 0x602   :  { %1572 = vsyncpa [#allocation6], 1 }
 0x603   :  { %1573 = vsyncpa [#allocation4], 1 }

</bundles_post_ra>
